<compile_context>
chip_gen: v7x
topology: tpu7x:2x2x1
jax: 0.10.0
libtpu: 0.0.40
codegen_flags: <defaults>
</compile_context>

<pallas_src>
import functools

import jax
import jax.numpy as jnp
from jax.experimental import pallas as pl
from jax.experimental.pallas import tpu as pltpu


# ----------------------------------------------------------------------------
# Fused encoder kernel: (FeaStConv -> ReLU -> BN) x 2 -> FeaStConv
# ----------------------------------------------------------------------------
def _encoder_kernel(*refs, num_heads, out_channels):
    x_ref, adj_t_ref, inv_deg_ref = refs[:3]
    out_ref = refs[-1]
    param_refs = refs[3:-1]

    H = num_heads
    inv_deg = inv_deg_ref[...]                           # [N_dst, 1] f32

    def feast(x, pw_ref, c_ref, b_ref, cout):
        # ---- projections: one bf16 MXU dot, f32 accumulation --------------
        #   pw = [W | u]  ->  lin = x @ W   [N, H*C]  (lane-0 aligned blocks)
        #                     q   = x @ u   [N, H]
        proj = jnp.dot(x.astype(jnp.bfloat16), pw_ref[...],
                       preferred_element_type=jnp.float32)
        lin = proj[:, :H * cout]                         # [N, H*C]
        q = proj[:, H * cout:]                           # [N, H]

        # ---- head-separable softmax ----------------------------------------
        #   A_h(j) = u_h.x_j (source term),  B_h(i) = c_h - u_h.x_i (dest term)
        # Per-axis max stabilization keeps all exp factors in (0, 1].
        a_log = q
        b_log = c_ref[...] - q
        ea = jnp.exp(a_log - jnp.max(a_log, axis=1, keepdims=True))   # [N, H]
        eb = jnp.exp(b_log - jnp.max(b_log, axis=1, keepdims=True))   # [N, H]

        # Denominator D[j, i] = sum_h EA[j,h] * EB[i,h]: one MXU dot (K = H),
        # in the transposed ([src, dst]) layout to match adj_t.
        d_t = jax.lax.dot_general(
            ea.astype(jnp.bfloat16), eb.astype(jnp.bfloat16),
            (((1,), (1,)), ((), ())),
            preferred_element_type=jnp.float32)          # [N_src, N_dst]

        # Exact reciprocal of the softmax denominator (correctness review);
        # normalized masked adjacency kept bf16 -- no resident f32 adj copy.
        wadj = adj_t_ref[...] * (1.0 / d_t).astype(jnp.bfloat16)      # [N_src, N_dst]

        # Fold the source factor EA into the per-head linear features (small,
        # [N, H*C]) so the aggregation stays a single lane-dense matmul.
        lin_p = jnp.concatenate(
            [ea[:, h:h + 1] * lin[:, h * cout:(h + 1) * cout] for h in range(H)],
            axis=1).astype(jnp.bfloat16)                 # [N_src, H*C]

        # Aggregation: ONE MXU dot, K = N (not H*N), bf16 in / f32 accumulate.
        #   agg[i, h*C + c] = sum_j adj[i,j]/D(i,j) * EA[j,h] * (x_j @ W_h)[c]
        agg = jax.lax.dot_general(
            wadj, lin_p, (((0,), (0,)), ((), ())),
            preferred_element_type=jnp.float32)          # [N_dst, H*C]

        # Destination factor EB and sum over heads (VPU, H*C wide).
        acc = eb[:, 0:1] * agg[:, :cout]
        for h in range(1, H):
            acc = acc + eb[:, h:h + 1] * agg[:, h * cout:(h + 1) * cout]

        return acc * inv_deg + b_ref[...]                # mean aggregation + bias

    def relu_bn(x, g_ref, be_ref):
        h = jnp.maximum(x, 0.0)                          # F.relu
        mean = jnp.mean(h, axis=0, keepdims=True)
        cen = h - mean
        var = jnp.mean(cen * cen, axis=0, keepdims=True) # biased var (training BN)
        scale = jax.lax.rsqrt(var + 1e-5) * g_ref[...]   # fold gamma on [1,C] row
        return cen * scale + be_ref[...]

    x = x_ref[...]
    idx = 0
    n_layers = len(out_channels)
    for l in range(n_layers):
        pw_ref, c_ref, b_ref = param_refs[idx:idx + 3]
        idx += 3
        x = feast(x, pw_ref, c_ref, b_ref, out_channels[l])
        if l < n_layers - 1:                             # ReLU + BN between layers
            g_ref, be_ref = param_refs[idx:idx + 2]
            idx += 2
            x = relu_bn(x, g_ref, be_ref)
    out_ref[...] = x


def graph_feature_encoder(x, adj_t, inv_deg, conv_params, bn_params, num_heads):
    out_channels = tuple(int(p["b"].shape[1]) for p in conv_params)
    n = x.shape[0]

    vmem = pl.BlockSpec(memory_space=pltpu.MemorySpace.VMEM)

    args = [x, adj_t, inv_deg]
    specs = [vmem, vmem, vmem]
    for i, p in enumerate(conv_params):
        args += [p["pw"], p["c"], p["b"]]
        specs += [vmem, vmem, vmem]
        if i < len(bn_params):
            args += [bn_params[i]["gamma"], bn_params[i]["beta"]]
            specs += [vmem, vmem]

    kernel = functools.partial(_encoder_kernel, num_heads=num_heads,
                               out_channels=out_channels)
    return pl.pallas_call(
        kernel,
        out_shape=jax.ShapeDtypeStruct((n, out_channels[-1]), jnp.float32),
        in_specs=specs,
        out_specs=vmem,
    )(*args)


# ----------------------------------------------------------------------------
# Parameter init (matches FeaStConv.reset_parameters style: c, bias zeros)
# ----------------------------------------------------------------------------
def init_params(key, in_features, conv_channels, num_heads):
    channels = [in_features] + list(conv_channels)
    conv_params, bn_params = [], []
    for fin, fout in zip(channels[:-1], channels[1:]):
        key, k1, k2 = jax.random.split(key, 3)
        scale = 1.0 / jnp.sqrt(jnp.float32(fin))
        w = jax.random.normal(k1, (fin, num_heads * fout), jnp.float32) * scale
        u = jax.random.normal(k2, (fin, num_heads), jnp.float32) * scale
        conv_params.append(dict(
            # Merged [W | u]: W first so lin starts at lane 0 (lane-aligned
            # per-head C-blocks); u last ([N,H] slice is tiny).  bf16 for MXU.
            pw=jnp.concatenate([w, u], axis=1).astype(jnp.bfloat16),
            c=jnp.zeros((1, num_heads), jnp.float32),    # per-head attention bias
            b=jnp.zeros((1, fout), jnp.float32),         # output bias
        ))
    for ch in conv_channels[:-1]:
        bn_params.append(dict(gamma=jnp.ones((1, ch), jnp.float32),
                              beta=jnp.zeros((1, ch), jnp.float32)))
    return conv_params, bn_params


if __name__ == "__main__":
    key = jax.random.PRNGKey(0)
    num_nodes, in_features = 16, 8
    conv_channels = [16, 16, 8]
    num_heads = 4
    num_edges = 48

    key, kx, ks, kd, kp = jax.random.split(key, 5)
    x = jax.random.normal(kx, (num_nodes, in_features), jnp.float32)
    # PyG edge convention: edge_index[0] = source j, edge_index[1] = target i
    src = jax.random.randint(ks, (num_edges,), 0, num_nodes)
    dst = jax.random.randint(kd, (num_edges,), 0, num_nodes)
    edge_index = jnp.stack([src, dst], axis=0).astype(jnp.int32)

    # Host glue: dense adjacency with self loops (FeaStConv with_self_loops=True).
    # adj[i, j] = multiplicity of edge j -> i.  Streamed to the kernel transposed
    # ([src, dst]) and in bf16; inv_deg precomputed in f32.
    adj = jnp.zeros((num_nodes, num_nodes), jnp.float32)
    adj = adj.at[edge_index[1], edge_index[0]].add(1.0)
    adj = adj + jnp.eye(num_nodes, dtype=jnp.float32)
    inv_deg = 1.0 / jnp.sum(adj, axis=1, keepdims=True)      # [N_dst, 1] f32
    adj_t = jnp.transpose(adj).astype(jnp.bfloat16)          # [N_src, N_dst] bf16

    conv_params, bn_params = init_params(kp, in_features, conv_channels, num_heads)

    out = graph_feature_encoder(x, adj_t, inv_deg, conv_params, bn_params, num_heads)
    out = jax.block_until_ready(out)

    assert out.shape == (num_nodes, conv_channels[-1]), out.shape
    assert bool(jnp.all(jnp.isfinite(out)))
    print("KERNEL_OK")
</pallas_src>

<mosaic_0001>
module attributes {stable_mosaic.version = 11 : i64} {
  func.func @_encoder_kernel(%arg0: memref<16x8xf32, #tpu.memory_space<vmem>>, %arg1: memref<16x16xbf16, #tpu.memory_space<vmem>>, %arg2: memref<16x1xf32, #tpu.memory_space<vmem>>, %arg3: memref<8x68xbf16, #tpu.memory_space<vmem>>, %arg4: memref<1x4xf32, #tpu.memory_space<vmem>>, %arg5: memref<1x16xf32, #tpu.memory_space<vmem>>, %arg6: memref<1x16xf32, #tpu.memory_space<vmem>>, %arg7: memref<1x16xf32, #tpu.memory_space<vmem>>, %arg8: memref<16x68xbf16, #tpu.memory_space<vmem>>, %arg9: memref<1x4xf32, #tpu.memory_space<vmem>>, %arg10: memref<1x16xf32, #tpu.memory_space<vmem>>, %arg11: memref<1x16xf32, #tpu.memory_space<vmem>>, %arg12: memref<1x16xf32, #tpu.memory_space<vmem>>, %arg13: memref<16x36xbf16, #tpu.memory_space<vmem>>, %arg14: memref<1x4xf32, #tpu.memory_space<vmem>>, %arg15: memref<1x8xf32, #tpu.memory_space<vmem>>, %arg16: memref<16x8xf32, #tpu.memory_space<vmem>>) attributes {dimension_semantics = [], scalar_prefetch = 0 : i64, scratch_operands = 0 : i64, tpu.core_type = #tpu.core_type<tc>} {
    %c0 = arith.constant 0 : index
    %c0_0 = arith.constant 0 : index
    %0 = vector.load %arg2[%c0, %c0_0] : memref<16x1xf32, #tpu.memory_space<vmem>>, vector<16x1xf32>
    %c0_1 = arith.constant 0 : index
    %c0_2 = arith.constant 0 : index
    %1 = vector.load %arg0[%c0_1, %c0_2] : memref<16x8xf32, #tpu.memory_space<vmem>>, vector<16x8xf32>
    %2 = arith.truncf %1 : vector<16x8xf32> to vector<16x8xbf16>
    %c0_3 = arith.constant 0 : index
    %c0_4 = arith.constant 0 : index
    %3 = vector.load %arg3[%c0_3, %c0_4] : memref<8x68xbf16, #tpu.memory_space<vmem>>, vector<8x68xbf16>
    %cst = arith.constant dense<0.000000e+00> : vector<16x68xf32>
    %4 = tpu.matmul %2, %3, %cst {dimension_numbers = #tpu.dot_dimension_numbers<[1], [0], [0], [1], [0, 0, 1, 1], [], []>} : vector<16x8xbf16>, vector<8x68xbf16>, vector<16x68xf32> -> vector<16x68xf32>
    %5 = vector.extract_strided_slice %4 {offsets = [0, 0], sizes = [16, 64], strides = [1, 1]} : vector<16x68xf32> to vector<16x64xf32>
    %6 = vector.extract_strided_slice %4 {offsets = [0, 64], sizes = [16, 4], strides = [1, 1]} : vector<16x68xf32> to vector<16x4xf32>
    %c0_5 = arith.constant 0 : index
    %c0_6 = arith.constant 0 : index
    %7 = vector.load %arg4[%c0_5, %c0_6] : memref<1x4xf32, #tpu.memory_space<vmem>>, vector<1x4xf32>
    %8 = vector.broadcast %7 : vector<1x4xf32> to vector<16x4xf32>
    %9 = arith.subf %8, %6 : vector<16x4xf32>
    %cst_7 = arith.constant dense<0xFF800000> : vector<16xf32>
    %10 = vector.multi_reduction <maximumf>, %6, %cst_7 [1] : vector<16x4xf32> to vector<16xf32>
    %11 = vector.shape_cast %10 : vector<16xf32> to vector<16x1xf32>
    %12 = vector.broadcast %11 : vector<16x1xf32> to vector<16x4xf32>
    %13 = arith.subf %6, %12 : vector<16x4xf32>
    %14 = math.exp %13 : vector<16x4xf32>
    %cst_8 = arith.constant dense<0xFF800000> : vector<16xf32>
    %15 = vector.multi_reduction <maximumf>, %9, %cst_8 [1] : vector<16x4xf32> to vector<16xf32>
    %16 = vector.shape_cast %15 : vector<16xf32> to vector<16x1xf32>
    %17 = vector.broadcast %16 : vector<16x1xf32> to vector<16x4xf32>
    %18 = arith.subf %9, %17 : vector<16x4xf32>
    %19 = math.exp %18 : vector<16x4xf32>
    %20 = arith.truncf %14 : vector<16x4xf32> to vector<16x4xbf16>
    %21 = arith.truncf %19 : vector<16x4xf32> to vector<16x4xbf16>
    %cst_9 = arith.constant dense<0.000000e+00> : vector<16x16xf32>
    %22 = tpu.matmul %20, %21, %cst_9 {dimension_numbers = #tpu.dot_dimension_numbers<[1], [1], [0], [0], [0, 0, 1, 0], [], []>} : vector<16x4xbf16>, vector<16x4xbf16>, vector<16x16xf32> -> vector<16x16xf32>
    %c0_10 = arith.constant 0 : index
    %c0_11 = arith.constant 0 : index
    %23 = vector.load %arg1[%c0_10, %c0_11] : memref<16x16xbf16, #tpu.memory_space<vmem>>, vector<16x16xbf16>
    %cst_12 = arith.constant 1.000000e+00 : f32
    %24 = vector.broadcast %cst_12 : f32 to vector<16x16xf32>
    %25 = arith.divf %24, %22 : vector<16x16xf32>
    %26 = arith.truncf %25 : vector<16x16xf32> to vector<16x16xbf16>
    %27 = arith.mulf %23, %26 : vector<16x16xbf16>
    %28 = vector.extract_strided_slice %14 {offsets = [0, 0], sizes = [16, 1], strides = [1, 1]} : vector<16x4xf32> to vector<16x1xf32>
    %29 = vector.extract_strided_slice %5 {offsets = [0, 0], sizes = [16, 16], strides = [1, 1]} : vector<16x64xf32> to vector<16x16xf32>
    %30 = vector.broadcast %28 : vector<16x1xf32> to vector<16x16xf32>
    %31 = arith.mulf %30, %29 : vector<16x16xf32>
    %32 = vector.extract_strided_slice %14 {offsets = [0, 1], sizes = [16, 1], strides = [1, 1]} : vector<16x4xf32> to vector<16x1xf32>
    %33 = vector.extract_strided_slice %5 {offsets = [0, 16], sizes = [16, 16], strides = [1, 1]} : vector<16x64xf32> to vector<16x16xf32>
    %34 = vector.broadcast %32 : vector<16x1xf32> to vector<16x16xf32>
    %35 = arith.mulf %34, %33 : vector<16x16xf32>
    %36 = vector.extract_strided_slice %14 {offsets = [0, 2], sizes = [16, 1], strides = [1, 1]} : vector<16x4xf32> to vector<16x1xf32>
    %37 = vector.extract_strided_slice %5 {offsets = [0, 32], sizes = [16, 16], strides = [1, 1]} : vector<16x64xf32> to vector<16x16xf32>
    %38 = vector.broadcast %36 : vector<16x1xf32> to vector<16x16xf32>
    %39 = arith.mulf %38, %37 : vector<16x16xf32>
    %40 = vector.extract_strided_slice %14 {offsets = [0, 3], sizes = [16, 1], strides = [1, 1]} : vector<16x4xf32> to vector<16x1xf32>
    %41 = vector.extract_strided_slice %5 {offsets = [0, 48], sizes = [16, 16], strides = [1, 1]} : vector<16x64xf32> to vector<16x16xf32>
    %42 = vector.broadcast %40 : vector<16x1xf32> to vector<16x16xf32>
    %43 = arith.mulf %42, %41 : vector<16x16xf32>
    %44 = tpu.concatenate %31, %35, %39, %43 in 1 : vector<16x16xf32>, vector<16x16xf32>, vector<16x16xf32>, vector<16x16xf32> -> vector<16x64xf32>
    %45 = arith.truncf %44 : vector<16x64xf32> to vector<16x64xbf16>
    %cst_13 = arith.constant dense<0.000000e+00> : vector<16x64xf32>
    %46 = tpu.matmul %27, %45, %cst_13 {dimension_numbers = #tpu.dot_dimension_numbers<[0], [0], [1], [1], [0, 1, 1, 1], [], []>} : vector<16x16xbf16>, vector<16x64xbf16>, vector<16x64xf32> -> vector<16x64xf32>
    %47 = vector.extract_strided_slice %19 {offsets = [0, 0], sizes = [16, 1], strides = [1, 1]} : vector<16x4xf32> to vector<16x1xf32>
    %48 = vector.extract_strided_slice %46 {offsets = [0, 0], sizes = [16, 16], strides = [1, 1]} : vector<16x64xf32> to vector<16x16xf32>
    %49 = vector.broadcast %47 : vector<16x1xf32> to vector<16x16xf32>
    %50 = arith.mulf %49, %48 : vector<16x16xf32>
    %51 = vector.extract_strided_slice %19 {offsets = [0, 1], sizes = [16, 1], strides = [1, 1]} : vector<16x4xf32> to vector<16x1xf32>
    %52 = vector.extract_strided_slice %46 {offsets = [0, 16], sizes = [16, 16], strides = [1, 1]} : vector<16x64xf32> to vector<16x16xf32>
    %53 = vector.broadcast %51 : vector<16x1xf32> to vector<16x16xf32>
    %54 = arith.mulf %53, %52 : vector<16x16xf32>
    %55 = arith.addf %50, %54 : vector<16x16xf32>
    %56 = vector.extract_strided_slice %19 {offsets = [0, 2], sizes = [16, 1], strides = [1, 1]} : vector<16x4xf32> to vector<16x1xf32>
    %57 = vector.extract_strided_slice %46 {offsets = [0, 32], sizes = [16, 16], strides = [1, 1]} : vector<16x64xf32> to vector<16x16xf32>
    %58 = vector.broadcast %56 : vector<16x1xf32> to vector<16x16xf32>
    %59 = arith.mulf %58, %57 : vector<16x16xf32>
    %60 = arith.addf %55, %59 : vector<16x16xf32>
    %61 = vector.extract_strided_slice %19 {offsets = [0, 3], sizes = [16, 1], strides = [1, 1]} : vector<16x4xf32> to vector<16x1xf32>
    %62 = vector.extract_strided_slice %46 {offsets = [0, 48], sizes = [16, 16], strides = [1, 1]} : vector<16x64xf32> to vector<16x16xf32>
    %63 = vector.broadcast %61 : vector<16x1xf32> to vector<16x16xf32>
    %64 = arith.mulf %63, %62 : vector<16x16xf32>
    %65 = arith.addf %60, %64 : vector<16x16xf32>
    %66 = vector.broadcast %0 : vector<16x1xf32> to vector<16x16xf32>
    %67 = arith.mulf %65, %66 : vector<16x16xf32>
    %c0_14 = arith.constant 0 : index
    %c0_15 = arith.constant 0 : index
    %68 = vector.load %arg5[%c0_14, %c0_15] : memref<1x16xf32, #tpu.memory_space<vmem>>, vector<1x16xf32>
    %69 = vector.broadcast %68 : vector<1x16xf32> to vector<16x16xf32>
    %70 = arith.addf %67, %69 : vector<16x16xf32>
    %cst_16 = arith.constant 0.000000e+00 : f32
    %71 = vector.broadcast %cst_16 : f32 to vector<16x16xf32>
    %72 = arith.maximumf %70, %71 : vector<16x16xf32>
    %cst_17 = arith.constant dense<0.000000e+00> : vector<16xf32>
    %73 = vector.multi_reduction <add>, %72, %cst_17 [0] : vector<16x16xf32> to vector<16xf32>
    %74 = vector.shape_cast %73 : vector<16xf32> to vector<1x16xf32>
    %cst_18 = arith.constant 1.600000e+01 : f32
    %75 = vector.broadcast %cst_18 : f32 to vector<1x16xf32>
    %76 = arith.divf %74, %75 : vector<1x16xf32>
    %77 = vector.broadcast %76 : vector<1x16xf32> to vector<16x16xf32>
    %78 = arith.subf %72, %77 : vector<16x16xf32>
    %79 = arith.mulf %78, %78 : vector<16x16xf32>
    %cst_19 = arith.constant dense<0.000000e+00> : vector<16xf32>
    %80 = vector.multi_reduction <add>, %79, %cst_19 [0] : vector<16x16xf32> to vector<16xf32>
    %81 = vector.shape_cast %80 : vector<16xf32> to vector<1x16xf32>
    %cst_20 = arith.constant 1.600000e+01 : f32
    %82 = vector.broadcast %cst_20 : f32 to vector<1x16xf32>
    %83 = arith.divf %81, %82 : vector<1x16xf32>
    %cst_21 = arith.constant 9.99999974E-6 : f32
    %84 = vector.broadcast %cst_21 : f32 to vector<1x16xf32>
    %85 = arith.addf %83, %84 : vector<1x16xf32>
    %86 = math.rsqrt %85 : vector<1x16xf32>
    %c0_22 = arith.constant 0 : index
    %c0_23 = arith.constant 0 : index
    %87 = vector.load %arg6[%c0_22, %c0_23] : memref<1x16xf32, #tpu.memory_space<vmem>>, vector<1x16xf32>
    %88 = arith.mulf %86, %87 : vector<1x16xf32>
    %89 = vector.broadcast %88 : vector<1x16xf32> to vector<16x16xf32>
    %90 = arith.mulf %78, %89 : vector<16x16xf32>
    %c0_24 = arith.constant 0 : index
    %c0_25 = arith.constant 0 : index
    %91 = vector.load %arg7[%c0_24, %c0_25] : memref<1x16xf32, #tpu.memory_space<vmem>>, vector<1x16xf32>
    %92 = vector.broadcast %91 : vector<1x16xf32> to vector<16x16xf32>
    %93 = arith.addf %90, %92 : vector<16x16xf32>
    %94 = arith.truncf %93 : vector<16x16xf32> to vector<16x16xbf16>
    %c0_26 = arith.constant 0 : index
    %c0_27 = arith.constant 0 : index
    %95 = vector.load %arg8[%c0_26, %c0_27] : memref<16x68xbf16, #tpu.memory_space<vmem>>, vector<16x68xbf16>
    %cst_28 = arith.constant dense<0.000000e+00> : vector<16x68xf32>
    %96 = tpu.matmul %94, %95, %cst_28 {dimension_numbers = #tpu.dot_dimension_numbers<[1], [0], [0], [1], [0, 0, 1, 1], [], []>} : vector<16x16xbf16>, vector<16x68xbf16>, vector<16x68xf32> -> vector<16x68xf32>
    %97 = vector.extract_strided_slice %96 {offsets = [0, 0], sizes = [16, 64], strides = [1, 1]} : vector<16x68xf32> to vector<16x64xf32>
    %98 = vector.extract_strided_slice %96 {offsets = [0, 64], sizes = [16, 4], strides = [1, 1]} : vector<16x68xf32> to vector<16x4xf32>
    %c0_29 = arith.constant 0 : index
    %c0_30 = arith.constant 0 : index
    %99 = vector.load %arg9[%c0_29, %c0_30] : memref<1x4xf32, #tpu.memory_space<vmem>>, vector<1x4xf32>
    %100 = vector.broadcast %99 : vector<1x4xf32> to vector<16x4xf32>
    %101 = arith.subf %100, %98 : vector<16x4xf32>
    %cst_31 = arith.constant dense<0xFF800000> : vector<16xf32>
    %102 = vector.multi_reduction <maximumf>, %98, %cst_31 [1] : vector<16x4xf32> to vector<16xf32>
    %103 = vector.shape_cast %102 : vector<16xf32> to vector<16x1xf32>
    %104 = vector.broadcast %103 : vector<16x1xf32> to vector<16x4xf32>
    %105 = arith.subf %98, %104 : vector<16x4xf32>
    %106 = math.exp %105 : vector<16x4xf32>
    %cst_32 = arith.constant dense<0xFF800000> : vector<16xf32>
    %107 = vector.multi_reduction <maximumf>, %101, %cst_32 [1] : vector<16x4xf32> to vector<16xf32>
    %108 = vector.shape_cast %107 : vector<16xf32> to vector<16x1xf32>
    %109 = vector.broadcast %108 : vector<16x1xf32> to vector<16x4xf32>
    %110 = arith.subf %101, %109 : vector<16x4xf32>
    %111 = math.exp %110 : vector<16x4xf32>
    %112 = arith.truncf %106 : vector<16x4xf32> to vector<16x4xbf16>
    %113 = arith.truncf %111 : vector<16x4xf32> to vector<16x4xbf16>
    %cst_33 = arith.constant dense<0.000000e+00> : vector<16x16xf32>
    %114 = tpu.matmul %112, %113, %cst_33 {dimension_numbers = #tpu.dot_dimension_numbers<[1], [1], [0], [0], [0, 0, 1, 0], [], []>} : vector<16x4xbf16>, vector<16x4xbf16>, vector<16x16xf32> -> vector<16x16xf32>
    %c0_34 = arith.constant 0 : index
    %c0_35 = arith.constant 0 : index
    %115 = vector.load %arg1[%c0_34, %c0_35] : memref<16x16xbf16, #tpu.memory_space<vmem>>, vector<16x16xbf16>
    %cst_36 = arith.constant 1.000000e+00 : f32
    %116 = vector.broadcast %cst_36 : f32 to vector<16x16xf32>
    %117 = arith.divf %116, %114 : vector<16x16xf32>
    %118 = arith.truncf %117 : vector<16x16xf32> to vector<16x16xbf16>
    %119 = arith.mulf %115, %118 : vector<16x16xbf16>
    %120 = vector.extract_strided_slice %106 {offsets = [0, 0], sizes = [16, 1], strides = [1, 1]} : vector<16x4xf32> to vector<16x1xf32>
    %121 = vector.extract_strided_slice %97 {offsets = [0, 0], sizes = [16, 16], strides = [1, 1]} : vector<16x64xf32> to vector<16x16xf32>
    %122 = vector.broadcast %120 : vector<16x1xf32> to vector<16x16xf32>
    %123 = arith.mulf %122, %121 : vector<16x16xf32>
    %124 = vector.extract_strided_slice %106 {offsets = [0, 1], sizes = [16, 1], strides = [1, 1]} : vector<16x4xf32> to vector<16x1xf32>
    %125 = vector.extract_strided_slice %97 {offsets = [0, 16], sizes = [16, 16], strides = [1, 1]} : vector<16x64xf32> to vector<16x16xf32>
    %126 = vector.broadcast %124 : vector<16x1xf32> to vector<16x16xf32>
    %127 = arith.mulf %126, %125 : vector<16x16xf32>
    %128 = vector.extract_strided_slice %106 {offsets = [0, 2], sizes = [16, 1], strides = [1, 1]} : vector<16x4xf32> to vector<16x1xf32>
    %129 = vector.extract_strided_slice %97 {offsets = [0, 32], sizes = [16, 16], strides = [1, 1]} : vector<16x64xf32> to vector<16x16xf32>
    %130 = vector.broadcast %128 : vector<16x1xf32> to vector<16x16xf32>
    %131 = arith.mulf %130, %129 : vector<16x16xf32>
    %132 = vector.extract_strided_slice %106 {offsets = [0, 3], sizes = [16, 1], strides = [1, 1]} : vector<16x4xf32> to vector<16x1xf32>
    %133 = vector.extract_strided_slice %97 {offsets = [0, 48], sizes = [16, 16], strides = [1, 1]} : vector<16x64xf32> to vector<16x16xf32>
    %134 = vector.broadcast %132 : vector<16x1xf32> to vector<16x16xf32>
    %135 = arith.mulf %134, %133 : vector<16x16xf32>
    %136 = tpu.concatenate %123, %127, %131, %135 in 1 : vector<16x16xf32>, vector<16x16xf32>, vector<16x16xf32>, vector<16x16xf32> -> vector<16x64xf32>
    %137 = arith.truncf %136 : vector<16x64xf32> to vector<16x64xbf16>
    %cst_37 = arith.constant dense<0.000000e+00> : vector<16x64xf32>
    %138 = tpu.matmul %119, %137, %cst_37 {dimension_numbers = #tpu.dot_dimension_numbers<[0], [0], [1], [1], [0, 1, 1, 1], [], []>} : vector<16x16xbf16>, vector<16x64xbf16>, vector<16x64xf32> -> vector<16x64xf32>
    %139 = vector.extract_strided_slice %111 {offsets = [0, 0], sizes = [16, 1], strides = [1, 1]} : vector<16x4xf32> to vector<16x1xf32>
    %140 = vector.extract_strided_slice %138 {offsets = [0, 0], sizes = [16, 16], strides = [1, 1]} : vector<16x64xf32> to vector<16x16xf32>
    %141 = vector.broadcast %139 : vector<16x1xf32> to vector<16x16xf32>
    %142 = arith.mulf %141, %140 : vector<16x16xf32>
    %143 = vector.extract_strided_slice %111 {offsets = [0, 1], sizes = [16, 1], strides = [1, 1]} : vector<16x4xf32> to vector<16x1xf32>
    %144 = vector.extract_strided_slice %138 {offsets = [0, 16], sizes = [16, 16], strides = [1, 1]} : vector<16x64xf32> to vector<16x16xf32>
    %145 = vector.broadcast %143 : vector<16x1xf32> to vector<16x16xf32>
    %146 = arith.mulf %145, %144 : vector<16x16xf32>
    %147 = arith.addf %142, %146 : vector<16x16xf32>
    %148 = vector.extract_strided_slice %111 {offsets = [0, 2], sizes = [16, 1], strides = [1, 1]} : vector<16x4xf32> to vector<16x1xf32>
    %149 = vector.extract_strided_slice %138 {offsets = [0, 32], sizes = [16, 16], strides = [1, 1]} : vector<16x64xf32> to vector<16x16xf32>
    %150 = vector.broadcast %148 : vector<16x1xf32> to vector<16x16xf32>
    %151 = arith.mulf %150, %149 : vector<16x16xf32>
    %152 = arith.addf %147, %151 : vector<16x16xf32>
    %153 = vector.extract_strided_slice %111 {offsets = [0, 3], sizes = [16, 1], strides = [1, 1]} : vector<16x4xf32> to vector<16x1xf32>
    %154 = vector.extract_strided_slice %138 {offsets = [0, 48], sizes = [16, 16], strides = [1, 1]} : vector<16x64xf32> to vector<16x16xf32>
    %155 = vector.broadcast %153 : vector<16x1xf32> to vector<16x16xf32>
    %156 = arith.mulf %155, %154 : vector<16x16xf32>
    %157 = arith.addf %152, %156 : vector<16x16xf32>
    %158 = vector.broadcast %0 : vector<16x1xf32> to vector<16x16xf32>
    %159 = arith.mulf %157, %158 : vector<16x16xf32>
    %c0_38 = arith.constant 0 : index
    %c0_39 = arith.constant 0 : index
    %160 = vector.load %arg10[%c0_38, %c0_39] : memref<1x16xf32, #tpu.memory_space<vmem>>, vector<1x16xf32>
    %161 = vector.broadcast %160 : vector<1x16xf32> to vector<16x16xf32>
    %162 = arith.addf %159, %161 : vector<16x16xf32>
    %cst_40 = arith.constant 0.000000e+00 : f32
    %163 = vector.broadcast %cst_40 : f32 to vector<16x16xf32>
    %164 = arith.maximumf %162, %163 : vector<16x16xf32>
    %cst_41 = arith.constant dense<0.000000e+00> : vector<16xf32>
    %165 = vector.multi_reduction <add>, %164, %cst_41 [0] : vector<16x16xf32> to vector<16xf32>
    %166 = vector.shape_cast %165 : vector<16xf32> to vector<1x16xf32>
    %cst_42 = arith.constant 1.600000e+01 : f32
    %167 = vector.broadcast %cst_42 : f32 to vector<1x16xf32>
    %168 = arith.divf %166, %167 : vector<1x16xf32>
    %169 = vector.broadcast %168 : vector<1x16xf32> to vector<16x16xf32>
    %170 = arith.subf %164, %169 : vector<16x16xf32>
    %171 = arith.mulf %170, %170 : vector<16x16xf32>
    %cst_43 = arith.constant dense<0.000000e+00> : vector<16xf32>
    %172 = vector.multi_reduction <add>, %171, %cst_43 [0] : vector<16x16xf32> to vector<16xf32>
    %173 = vector.shape_cast %172 : vector<16xf32> to vector<1x16xf32>
    %cst_44 = arith.constant 1.600000e+01 : f32
    %174 = vector.broadcast %cst_44 : f32 to vector<1x16xf32>
    %175 = arith.divf %173, %174 : vector<1x16xf32>
    %cst_45 = arith.constant 9.99999974E-6 : f32
    %176 = vector.broadcast %cst_45 : f32 to vector<1x16xf32>
    %177 = arith.addf %175, %176 : vector<1x16xf32>
    %178 = math.rsqrt %177 : vector<1x16xf32>
    %c0_46 = arith.constant 0 : index
    %c0_47 = arith.constant 0 : index
    %179 = vector.load %arg11[%c0_46, %c0_47] : memref<1x16xf32, #tpu.memory_space<vmem>>, vector<1x16xf32>
    %180 = arith.mulf %178, %179 : vector<1x16xf32>
    %181 = vector.broadcast %180 : vector<1x16xf32> to vector<16x16xf32>
    %182 = arith.mulf %170, %181 : vector<16x16xf32>
    %c0_48 = arith.constant 0 : index
    %c0_49 = arith.constant 0 : index
    %183 = vector.load %arg12[%c0_48, %c0_49] : memref<1x16xf32, #tpu.memory_space<vmem>>, vector<1x16xf32>
    %184 = vector.broadcast %183 : vector<1x16xf32> to vector<16x16xf32>
    %185 = arith.addf %182, %184 : vector<16x16xf32>
    %186 = arith.truncf %185 : vector<16x16xf32> to vector<16x16xbf16>
    %c0_50 = arith.constant 0 : index
    %c0_51 = arith.constant 0 : index
    %187 = vector.load %arg13[%c0_50, %c0_51] : memref<16x36xbf16, #tpu.memory_space<vmem>>, vector<16x36xbf16>
    %cst_52 = arith.constant dense<0.000000e+00> : vector<16x36xf32>
    %188 = tpu.matmul %186, %187, %cst_52 {dimension_numbers = #tpu.dot_dimension_numbers<[1], [0], [0], [1], [0, 0, 1, 1], [], []>} : vector<16x16xbf16>, vector<16x36xbf16>, vector<16x36xf32> -> vector<16x36xf32>
    %189 = vector.extract_strided_slice %188 {offsets = [0, 0], sizes = [16, 32], strides = [1, 1]} : vector<16x36xf32> to vector<16x32xf32>
    %190 = vector.extract_strided_slice %188 {offsets = [0, 32], sizes = [16, 4], strides = [1, 1]} : vector<16x36xf32> to vector<16x4xf32>
    %c0_53 = arith.constant 0 : index
    %c0_54 = arith.constant 0 : index
    %191 = vector.load %arg14[%c0_53, %c0_54] : memref<1x4xf32, #tpu.memory_space<vmem>>, vector<1x4xf32>
    %192 = vector.broadcast %191 : vector<1x4xf32> to vector<16x4xf32>
    %193 = arith.subf %192, %190 : vector<16x4xf32>
    %cst_55 = arith.constant dense<0xFF800000> : vector<16xf32>
    %194 = vector.multi_reduction <maximumf>, %190, %cst_55 [1] : vector<16x4xf32> to vector<16xf32>
    %195 = vector.shape_cast %194 : vector<16xf32> to vector<16x1xf32>
    %196 = vector.broadcast %195 : vector<16x1xf32> to vector<16x4xf32>
    %197 = arith.subf %190, %196 : vector<16x4xf32>
    %198 = math.exp %197 : vector<16x4xf32>
    %cst_56 = arith.constant dense<0xFF800000> : vector<16xf32>
    %199 = vector.multi_reduction <maximumf>, %193, %cst_56 [1] : vector<16x4xf32> to vector<16xf32>
    %200 = vector.shape_cast %199 : vector<16xf32> to vector<16x1xf32>
    %201 = vector.broadcast %200 : vector<16x1xf32> to vector<16x4xf32>
    %202 = arith.subf %193, %201 : vector<16x4xf32>
    %203 = math.exp %202 : vector<16x4xf32>
    %204 = arith.truncf %198 : vector<16x4xf32> to vector<16x4xbf16>
    %205 = arith.truncf %203 : vector<16x4xf32> to vector<16x4xbf16>
    %cst_57 = arith.constant dense<0.000000e+00> : vector<16x16xf32>
    %206 = tpu.matmul %204, %205, %cst_57 {dimension_numbers = #tpu.dot_dimension_numbers<[1], [1], [0], [0], [0, 0, 1, 0], [], []>} : vector<16x4xbf16>, vector<16x4xbf16>, vector<16x16xf32> -> vector<16x16xf32>
    %c0_58 = arith.constant 0 : index
    %c0_59 = arith.constant 0 : index
    %207 = vector.load %arg1[%c0_58, %c0_59] : memref<16x16xbf16, #tpu.memory_space<vmem>>, vector<16x16xbf16>
    %cst_60 = arith.constant 1.000000e+00 : f32
    %208 = vector.broadcast %cst_60 : f32 to vector<16x16xf32>
    %209 = arith.divf %208, %206 : vector<16x16xf32>
    %210 = arith.truncf %209 : vector<16x16xf32> to vector<16x16xbf16>
    %211 = arith.mulf %207, %210 : vector<16x16xbf16>
    %212 = vector.extract_strided_slice %198 {offsets = [0, 0], sizes = [16, 1], strides = [1, 1]} : vector<16x4xf32> to vector<16x1xf32>
    %213 = vector.extract_strided_slice %189 {offsets = [0, 0], sizes = [16, 8], strides = [1, 1]} : vector<16x32xf32> to vector<16x8xf32>
    %214 = vector.broadcast %212 : vector<16x1xf32> to vector<16x8xf32>
    %215 = arith.mulf %214, %213 : vector<16x8xf32>
    %216 = vector.extract_strided_slice %198 {offsets = [0, 1], sizes = [16, 1], strides = [1, 1]} : vector<16x4xf32> to vector<16x1xf32>
    %217 = vector.extract_strided_slice %189 {offsets = [0, 8], sizes = [16, 8], strides = [1, 1]} : vector<16x32xf32> to vector<16x8xf32>
    %218 = vector.broadcast %216 : vector<16x1xf32> to vector<16x8xf32>
    %219 = arith.mulf %218, %217 : vector<16x8xf32>
    %220 = vector.extract_strided_slice %198 {offsets = [0, 2], sizes = [16, 1], strides = [1, 1]} : vector<16x4xf32> to vector<16x1xf32>
    %221 = vector.extract_strided_slice %189 {offsets = [0, 16], sizes = [16, 8], strides = [1, 1]} : vector<16x32xf32> to vector<16x8xf32>
    %222 = vector.broadcast %220 : vector<16x1xf32> to vector<16x8xf32>
    %223 = arith.mulf %222, %221 : vector<16x8xf32>
    %224 = vector.extract_strided_slice %198 {offsets = [0, 3], sizes = [16, 1], strides = [1, 1]} : vector<16x4xf32> to vector<16x1xf32>
    %225 = vector.extract_strided_slice %189 {offsets = [0, 24], sizes = [16, 8], strides = [1, 1]} : vector<16x32xf32> to vector<16x8xf32>
    %226 = vector.broadcast %224 : vector<16x1xf32> to vector<16x8xf32>
    %227 = arith.mulf %226, %225 : vector<16x8xf32>
    %228 = tpu.concatenate %215, %219, %223, %227 in 1 : vector<16x8xf32>, vector<16x8xf32>, vector<16x8xf32>, vector<16x8xf32> -> vector<16x32xf32>
    %229 = arith.truncf %228 : vector<16x32xf32> to vector<16x32xbf16>
    %cst_61 = arith.constant dense<0.000000e+00> : vector<16x32xf32>
    %230 = tpu.matmul %211, %229, %cst_61 {dimension_numbers = #tpu.dot_dimension_numbers<[0], [0], [1], [1], [0, 1, 1, 1], [], []>} : vector<16x16xbf16>, vector<16x32xbf16>, vector<16x32xf32> -> vector<16x32xf32>
    %231 = vector.extract_strided_slice %203 {offsets = [0, 0], sizes = [16, 1], strides = [1, 1]} : vector<16x4xf32> to vector<16x1xf32>
    %232 = vector.extract_strided_slice %230 {offsets = [0, 0], sizes = [16, 8], strides = [1, 1]} : vector<16x32xf32> to vector<16x8xf32>
    %233 = vector.broadcast %231 : vector<16x1xf32> to vector<16x8xf32>
    %234 = arith.mulf %233, %232 : vector<16x8xf32>
    %235 = vector.extract_strided_slice %203 {offsets = [0, 1], sizes = [16, 1], strides = [1, 1]} : vector<16x4xf32> to vector<16x1xf32>
    %236 = vector.extract_strided_slice %230 {offsets = [0, 8], sizes = [16, 8], strides = [1, 1]} : vector<16x32xf32> to vector<16x8xf32>
    %237 = vector.broadcast %235 : vector<16x1xf32> to vector<16x8xf32>
    %238 = arith.mulf %237, %236 : vector<16x8xf32>
    %239 = arith.addf %234, %238 : vector<16x8xf32>
    %240 = vector.extract_strided_slice %203 {offsets = [0, 2], sizes = [16, 1], strides = [1, 1]} : vector<16x4xf32> to vector<16x1xf32>
    %241 = vector.extract_strided_slice %230 {offsets = [0, 16], sizes = [16, 8], strides = [1, 1]} : vector<16x32xf32> to vector<16x8xf32>
    %242 = vector.broadcast %240 : vector<16x1xf32> to vector<16x8xf32>
    %243 = arith.mulf %242, %241 : vector<16x8xf32>
    %244 = arith.addf %239, %243 : vector<16x8xf32>
    %245 = vector.extract_strided_slice %203 {offsets = [0, 3], sizes = [16, 1], strides = [1, 1]} : vector<16x4xf32> to vector<16x1xf32>
    %246 = vector.extract_strided_slice %230 {offsets = [0, 24], sizes = [16, 8], strides = [1, 1]} : vector<16x32xf32> to vector<16x8xf32>
    %247 = vector.broadcast %245 : vector<16x1xf32> to vector<16x8xf32>
    %248 = arith.mulf %247, %246 : vector<16x8xf32>
    %249 = arith.addf %244, %248 : vector<16x8xf32>
    %250 = vector.broadcast %0 : vector<16x1xf32> to vector<16x8xf32>
    %251 = arith.mulf %249, %250 : vector<16x8xf32>
    %c0_62 = arith.constant 0 : index
    %c0_63 = arith.constant 0 : index
    %252 = vector.load %arg15[%c0_62, %c0_63] : memref<1x8xf32, #tpu.memory_space<vmem>>, vector<1x8xf32>
    %253 = vector.broadcast %252 : vector<1x8xf32> to vector<16x8xf32>
    %254 = arith.addf %251, %253 : vector<16x8xf32>
    %c0_64 = arith.constant 0 : index
    %c0_65 = arith.constant 0 : index
    %255 = vector.load %arg16[%c0_64, %c0_65] : memref<16x8xf32, #tpu.memory_space<vmem>>, vector<16x8xf32>
    tpu.vector_store %arg16[%c0_64, %c0_65], %254 {strides = array<i32>} : memref<16x8xf32, #tpu.memory_space<vmem>>, vector<16x8xf32>,
    return
  }
}

</mosaic_0001>

<bundles_post_ra>
// kernel: tpu_custom_call.1
= control target key start
LH: loop header
LB: loop body
LE: loop exit
PB: predicated region body
PF: predicated region fallthrough
CT: control target
= control target key end

     0   :  { %vm64_vm0 = vcmask 1043456   ;;  %v1447_v0 = vmov 0.0   ;;  %vm1448_vm1 = vmmov 0   ;;  %vm60_vm2 = vcmask 64512   ;;  %s1458_s21 = smov 112   ;;  %s1460_s22 = smov 80   ;;  %s1835_s3 = inlined_call_operand.vmem [shape: bf16[8,68], index: 3, kind: input, shape index: {}]   ;;  %s1836_s0 = inlined_call_operand.vmem [shape: f32[16,8], index: 0, kind: input, shape index: {}]   ;;  %s1837_s4 = inlined_call_operand.vmem [shape: f32[1,4], index: 4, kind: input, shape index: {}]   ;;  %s1838_s1 = inlined_call_operand.vmem [shape: bf16[16,16], index: 1, kind: input, shape index: {}]   ;;  %s1839_s2 = inlined_call_operand.vmem [shape: f32[16,1], index: 2, kind: input, shape index: {}]   ;;  %s1840_s8 = inlined_call_operand.vmem [shape: bf16[16,68], index: 8, kind: input, shape index: {}]   ;;  %s1841_s5 = inlined_call_operand.vmem [shape: f32[1,16], index: 5, kind: input, shape index: {}]   ;;  %s1842_s6 = inlined_call_operand.vmem [shape: f32[1,16], index: 6, kind: input, shape index: {}]   ;;  %s1843_s7 = inlined_call_operand.vmem [shape: f32[1,16], index: 7, kind: input, shape index: {}]   ;;  %s1844_s9 = inlined_call_operand.vmem [shape: f32[1,4], index: 9, kind: input, shape index: {}]   ;;  %s1845_s13 = inlined_call_operand.vmem [shape: bf16[16,36], index: 13, kind: input, shape index: {}]   ;;  %s1846_s10 = inlined_call_operand.vmem [shape: f32[1,16], index: 10, kind: input, shape index: {}]   ;;  %s1847_s11 = inlined_call_operand.vmem [shape: f32[1,16], index: 11, kind: input, shape index: {}]   ;;  %s1848_s12 = inlined_call_operand.vmem [shape: f32[1,16], index: 12, kind: input, shape index: {}]   ;;  %s1849_s14 = inlined_call_operand.vmem [shape: f32[1,4], index: 14, kind: input, shape index: {}]   ;;  %s1850_s15 = inlined_call_operand.vmem [shape: f32[1,8], index: 15, kind: input, shape index: {}]   ;;  %s1851_s16 = inlined_call_operand.vmem [shape: f32[16,8], index: 16, kind: output, shape index: {}]  }
   0x1   :  { %1852 = sst [smem:[#allocation2_spill]] %s1835_s3  ;;  %1298 = vmatprep.subr.bf16.mxu0 %v1447_v0  ;;  %1300 = vmatprep.mubr.msk.bf16.mxu0 %vm1448_vm1, %v1447_v0  ;;  %v56_v2 = vld [vmem:[%s1836_s0] sm:$0xff]  ;;  %v57_v3 = vld [vmem:[%s1836_s0 + $0x8] sm:$0xff]  ;;  %vm126_vm3 = vcmask 556544   ;;  %s1449_s0 = smov 64   ;;  %v1450_v12 = vmov 65  }
   0x2   :  { %s1853_s23 = sld [smem:[#allocation2_spill]]  ;;  %v58_v5 = vpack.c.bf16 %v57_v3, %v56_v2  ;;  %1304 = vmatprep.subr.bf16.mxu1 %v1447_v0  ;;  %1306 = vmatprep.mubr.msk.bf16.mxu1 %vm1448_vm1, %v1447_v0  ;;  %v1451_v13 = vmov 64   ;;  %v1247_v14 = vld [vmem:[%s1837_s4] ss:$0 sm:$0xff]  ;;  %vm139_vm4 = vcmask 31744   ;;  %v1452_v30 = vmov 1  }
   0x3   :  { %1374 = vset.pattern.permute.xlu0 %v1450_v12  ;;  %1372 = vset.pattern.permute.xlu1 %v1451_v13  ;;  %v1453_v31 = vmov 66   ;;  %v1454_v32 = vmov 67   ;;  %v1455_v43 = vmov 2   ;;  %v1456_v45 = vmov 0   ;;  %s1466_s17 = smov 104  }
   0x4   :  { %vm262_vm5 = vcmask 130048   ;;  %vm265_vm6 = vcmask 261120   ;;  %vm268_vm7 = vcmask 392192   ;;  %vm950_vm8 = vcmask 294144  }
   0x5   :  { %vm1087_vm9 = vcmask 195584  }
   0x8   :  { %v59_v1 = vld [vmem:[%s1853_s23] sm:$0xf] }
   0x9   :  { %v66_v4 = vsel %vm64_vm0, %v59_v1, 0 }
   0xa   :  { %1299 = vmatpush3.bf16.msra.mxu0 %v66_v4 }
   0xb   :  { %1310 = vmatprep.subr.bf16.mxu0 %v1447_v0 }
   0xd   :  { %1301 = vmatmul.mubr.msk.bf16.vlgmr.msra.gmra.mrb[0].mxu0 %vm60_vm2, %v58_v5 }
   0xe   :  { %1312 = vmatprep.mubr.msk.bf16.mxu0 %vm1448_vm1, %v1447_v0 }
  0xe0   :  { %v1571_v6 = vpop.f32.mrb[0].mxu0 }
  0xe1   :  { %118 = vrot.lane.b32.xlu0 %v1571_v6, %s1449_s0  ;;  %v1302_v7 = vpop.f32.mrb[1].mxu0  ;;  %v127_v8 = vsel %vm126_vm3, %v1571_v6, -inf }
  0xe2   :  { %128 = vmax.xlane.f32.xlu1 %v127_v8  ;;  %v1577_v9 = vpop.f32.mrb[2].mxu0 }
  0xe3   :  { %v1303_v10 = vpop.f32.mrb[3].mxu0  ;;  %v130_v11 = vsel %vm126_vm3, %v1577_v9, -inf }
  0xe5   :  { %120 = vrot.lane.b32.xlu0 %v1577_v9, %s1449_s0 }
  0xe6   :  { %131 = vmax.xlane.f32.xlu1 %v130_v11 }
 0x153   :  { %v119_v15 = vpop.permute.xlu0 %118 }
 0x154   :  { %v124_v16 = vsub.f32 %v1247_v14, %v119_v15  ;;  %v1632_v15 = vld [vmem:[%s1838_s1] sm:$0xf] }
 0x156   :  { %v140_v17 = vsel %vm139_vm4, %v124_v16, -inf }
 0x157   :  { %141 = vmax.xlane.f32.xlu0 %v140_v17  ;;  %v121_v18 = vpop.permute.xlu0 %120 }
 0x158   :  { %v125_v19 = vsub.f32 %v1247_v14, %v121_v18 }
 0x15a   :  { %v143_v20 = vsel %vm139_vm4, %v125_v19, -inf }
 0x15b   :  { %144 = vmax.xlane.f32.xlu1 %v143_v20 }
 0x16f   :  { %v129_v21 = vpop.xlane.xlu1 %128 }
 0x170   :  { %v133_v22 = vsub.f32 %v1571_v6, %v129_v21  ;;  %v1457_v21 = vmov 3  }
 0x172   :  { %v135_v23 = vmul.f32 1.442695, %v133_v22  ;;  %v55_v22 = vld [vmem:[%s1839_s2 + $0x8] sm:$0xff] }
 0x173   :  { %v132_v24 = vpop.xlane.xlu1 %131 }
 0x174   :  { %v134_v25 = vsub.f32 %v1577_v9, %v132_v24  ;;  %1407 = vpow2.f32 %v135_v23  ;;  %v54_v23 = vld [vmem:[%s1839_s2] sm:$0xff]  ;;  %s1459_s2 = smov 96  }
 0x176   :  { %v137_v26 = vmul.f32 1.442695, %v134_v25 }
 0x178   :  { %1409 = vpow2.f32 %v137_v26 }
 0x17e   :  { %v1408_v27 = vpop.eup %1407 }
 0x182   :  { %v1410_v28 = vpop.eup %1409 }
 0x183   :  { %237 = vperm.xlu0 %1374, %v1410_v28   ;;  %v152_v29 = vpack.c.bf16 %v1410_v28, %v1408_v27 }
 0x185   :  { %155 = vrot.lane.b32.xlu1 %v152_v29, %s1449_s0 }
 0x187   :  { %1377 = vset.pattern.permute.xlu0 %v1452_v30 }
 0x189   :  { %222 = vperm.xlu1 %1372, %v1408_v27  }
 0x18d   :  { %227 = vperm.xlu1 %1372, %v1410_v28  }
 0x191   :  { %1373 = vset.pattern.permute.xlu1 %v1450_v12 }
 0x192   :  { %233 = vperm.xlu1 %1373, %v1408_v27  }
 0x196   :  { %1375 = vset.pattern.permute.xlu1 %v1453_v31 }
 0x197   :  { %243 = vperm.xlu1 %1375, %v1408_v27  }
 0x19b   :  { %247 = vperm.xlu1 %1375, %v1410_v28  }
 0x19f   :  { %1376 = vset.pattern.permute.xlu1 %v1454_v32 }
 0x1a0   :  { %253 = vperm.xlu1 %1376, %v1408_v27  }
 0x1a4   :  { %257 = vperm.xlu1 %1376, %v1410_v28  }
 0x1e4   :  { %v142_v33 = vpop.xlane.xlu0 %141 }
 0x1e5   :  { %v146_v34 = vsub.f32 %v124_v16, %v142_v33  ;;  %v1637_v16 = vld [vmem:[%s1838_s1 + $0x4] sm:$0xf] }
 0x1e7   :  { %v148_v35 = vmul.f32 1.442695, %v146_v34 }
 0x1e8   :  { %v145_v36 = vpop.xlane.xlu1 %144 }
 0x1e9   :  { %1411 = vpow2.f32 %v148_v35  ;;  %v147_v37 = vsub.f32 %v125_v19, %v145_v36 }
 0x1eb   :  { %v150_v38 = vmul.f32 1.442695, %v147_v37 }
 0x1ed   :  { %1413 = vpow2.f32 %v150_v38 }
 0x1f3   :  { %v1597_v39 = vpop.eup %1411 }
 0x1f4   :  { %351 = vperm.xlu0 %1377, %v1597_v39  }
 0x1f7   :  { %v1600_v40 = vpop.eup %1413  ;;  %v156_v44 = vpop.permute.xlu1 %155 }
 0x1f8   :  { %355 = vperm.xlu0 %1377, %v1600_v40   ;;  %v153_v41 = vpack.c.bf16 %v1600_v40, %v1597_v39 }
 0x1fa   :  { %v161_v42 = vsel %vm139_vm4, %v153_v41, 0 }
 0x1fb   :  { %1305 = vmatpush3.bf16.xpose.msra.mxu1 %v161_v42 }
 0x1fc   :  { %1379 = vset.pattern.permute.xlu0 %v1455_v43  ;;  %1316 = vmatprep.subr.bf16.mxu1 %v1447_v0 }
 0x1fd   :  { %375 = vperm.xlu0 %1379, %v1600_v40  }
 0x201   :  { %1381 = vset.pattern.permute.xlu0 %v1456_v45 }
 0x202   :  { %340 = vperm.xlu0 %1381, %v1597_v39   ;;  %1307 = vmatmul.mubr.msk.bf16.vlgmr.msra.gmra.mrb[0].mxu1 %vm139_vm4, %v156_v44  ;;  %v238_v51 = vpop.permute.xlu0 %237  ;;  %v1405_v44 = vld [vmem:[%s1840_s8] sm:$0xff]  }
 0x203   :  { %1318 = vmatprep.mubr.msk.bf16.mxu1 %vm1448_vm1, %v1447_v0  ;;  %v241_v57 = vmul.f32 %v238_v51, %v1577_v9  ;;  %1317 = vmatpush3.bf16.msra.mxu1 %v1405_v44 }
 0x204   :  { %1328 = vmatprep.subr.bf16.mxu1 %v1447_v0 }
 0x206   :  { %417 = vperm.xlu0 %1381, %v55_v22  }
 0x208   :  { %v223_v46 = vpop.permute.xlu1 %222 }
 0x209   :  { %v230_v58 = vmul.f32 %v223_v46, %v1571_v6 }
 0x20a   :  { %1384 = vset.pattern.permute.xlu0 %v1450_v12 }
 0x20c   :  { %v228_v47 = vpop.permute.xlu1 %227 }
 0x20d   :  { %v231_v53 = vmul.f32 %v228_v47, %v1577_v9 }
 0x20f   :  { %v264_v61 = vsel %vm262_vm5, %v231_v53, %v241_v57 }
 0x211   :  { %v234_v48 = vpop.permute.xlu1 %233 }
 0x212   :  { %v240_v54 = vmul.f32 %v234_v48, %v1571_v6 }
 0x214   :  { %v263_v62 = vsel %vm262_vm5, %v230_v58, %v240_v54 }
 0x216   :  { %v244_v49 = vpop.permute.xlu1 %243 }
 0x217   :  { %v250_v55 = vmul.f32 %v244_v49, %v1571_v6 }
 0x219   :  { %v266_v1 = vsel %vm265_vm6, %v263_v62, %v250_v55  ;;  %v1253_v62 = vld [vmem:[%s1841_s5] ss:$0 sm:$0xff] }
 0x21a   :  { %v248_v50 = vpop.permute.xlu1 %247 }
 0x21b   :  { %v251_v56 = vmul.f32 %v248_v50, %v1577_v9 }
 0x21d   :  { %v267_v2 = vsel %vm265_vm6, %v264_v61, %v251_v56 }
 0x21f   :  { %v254_v52 = vpop.permute.xlu1 %253 }
 0x220   :  { %v260_v59 = vmul.f32 %v254_v52, %v1571_v6 }
 0x222   :  { %v269_v3 = vsel %vm268_vm7, %v266_v1, %v260_v59 }
 0x223   :  { %v258_v60 = vpop.permute.xlu1 %257 }
 0x224   :  { %v261_v63 = vmul.f32 %v258_v60, %v1577_v9 }
 0x226   :  { %v270_v4 = vsel %vm268_vm7, %v267_v2, %v261_v63 }
 0x227   :  { %v271_v5 = vpack.c.bf16 %v270_v4, %v269_v3 }
 0x229   :  { %1311 = vmatpush3.bf16.msra.mxu0 %v271_v5 }
 0x22a   :  { %1322 = vmatprep.subr.bf16.mxu0 %v1447_v0 }
 0x273   :  { %v352_v25 = vpop.permute.xlu0 %351 }
 0x277   :  { %v356_v27 = vpop.permute.xlu0 %355 }
 0x27c   :  { %v376_v38 = vpop.permute.xlu0 %375 }
 0x281   :  { %v341_v47 = vpop.permute.xlu0 %340 }
 0x285   :  { %v1671_v49 = vpop.permute.xlu0 %417 }
 0x2d5   :  { %v197_v6 = vpop.f32.mrb[0].mxu1 }
 0x2d6   :  { %1415 = vrcp.f32 %v197_v6  ;;  %v1308_v7 = vpop.f32.mrb[1].mxu1 }
 0x2d7   :  { %v200_v8 = vpop.f32.mrb[2].mxu1 }
 0x2d8   :  { %1417 = vrcp.f32 %v200_v8  ;;  %v1309_v10 = vpop.f32.mrb[3].mxu1 }
 0x2e0   :  { %v1416_v11 = vpop.eup %1415 }
 0x2e1   :  { %v1274_v9 = vpack.c.bf16 %v1416_v11, %v1416_v11 }
 0x2e2   :  { %v1418_v14 = vpop.eup %1417 }
 0x2e3   :  { %v1275_v17 = vpack.c.bf16 %v1418_v14, %v1418_v14  ;;  %v218_v18 = vmul.bf16 %v1274_v9, %v1632_v15 }
 0x2e5   :  { %v219_v19 = vmul.bf16 %v1275_v17, %v1637_v16 }
 0x2e7   :  { %v1251_v20 = vcombine.low %v218_v18, %v219_v19 }
 0x2e9   :  { %278 = vxpose.xlu1.c.b16.start.end [1/1] (short) (narrow) %v1251_v20, 16 }
 0x2ed   :  { %1378 = vset.pattern.permute.xlu1 %v1455_v43 }
 0x2ee   :  { %371 = vperm.xlu1 %1378, %v1597_v39  }
 0x2f2   :  { %1380 = vset.pattern.permute.xlu1 %v1457_v21 }
 0x2f3   :  { %391 = vperm.xlu1 %1380, %v1597_v39  }
 0x2f7   :  { %395 = vperm.xlu1 %1380, %v1600_v40  }
 0x2fb   :  { %1382 = vset.pattern.permute.xlu1 %v1456_v45 }
 0x2fc   :  { %345 = vperm.xlu1 %1382, %v1600_v40  }
 0x300   :  { %412 = vperm.xlu1 %1382, %v54_v23  }
 0x304   :  { %1383 = vset.pattern.permute.xlu1 %v1451_v13 }
 0x34f   :  { %v286_v24 = vpop.trf.xlu1 }
 0x350   :  { %1313 = vmatmul.mubr.msk.bf16.vlgmr.msra.gmra.mrb[4].mxu0 %vm262_vm5, %v286_v24 }
 0x351   :  { %1324 = vmatprep.mubr.msk.bf16.mxu0 %vm1448_vm1, %v1447_v0 }
 0x36d   :  { %v372_v26 = vpop.permute.xlu1 %371 }
 0x372   :  { %v392_v37 = vpop.permute.xlu1 %391 }
 0x376   :  { %v396_v41 = vpop.permute.xlu1 %395 }
 0x37b   :  { %v346_v46 = vpop.permute.xlu1 %345 }
 0x37f   :  { %v1669_v48 = vpop.permute.xlu1 %412 }
 0x423   :  { %v331_v28 = vpop.f32.mrb[4].mxu0 }
 0x424   :  { %v1314_v29 = vpop.f32.mrb[5].mxu0  ;;  %v358_v33 = vmul.f32 %v352_v25, %v331_v28  ;;  %v378_v13 = vmul.f32 %v372_v26, %v331_v28  ;;  %v398_v40 = vmul.f32 %v392_v37, %v331_v28  ;;  %v348_v52 = vmul.f32 %v341_v47, %v331_v28 }
 0x425   :  { %v334_v34 = vpop.f32.mrb[6].mxu0 }
 0x426   :  { %362 = vrot.lane.b32.xlu1 %v358_v33, %s1458_s21  ;;  %v1315_v35 = vpop.f32.mrb[7].mxu0  ;;  %v359_v36 = vmul.f32 %v356_v27, %v334_v34  ;;  %v379_v39 = vmul.f32 %v376_v38, %v334_v34  ;;  %v399_v42 = vmul.f32 %v396_v41, %v334_v34  ;;  %v349_v55 = vmul.f32 %v346_v46, %v334_v34 }
 0x428   :  { %364 = vrot.lane.b32.xlu0 %v359_v36, %s1458_s21 }
 0x42a   :  { %382 = vrot.lane.b32.xlu1 %v378_v13, %s1459_s2 }
 0x42c   :  { %384 = vrot.lane.b32.xlu0 %v379_v39, %s1459_s2 }
 0x42e   :  { %402 = vrot.lane.b32.xlu1 %v398_v40, %s1460_s22  ;;  %v462_v40 = vlaneseq }
 0x430   :  { %404 = vrot.lane.b32.xlu0 %v399_v42, %s1460_s22  ;;  %v1682_v41 = vshrl.u32 %v462_v40, 7  ;;  %v460_v42 = vld [vmem:[%s1842_s6] sm:$0x1] }
 0x432   :  { %v464_v44 = vsub.s32 0, %v1682_v41 }
 0x498   :  { %v363_v50 = vpop.permute.xlu1 %362 }
 0x499   :  { %v368_v54 = vadd.f32 %v363_v50, %v348_v52 }
 0x49a   :  { %v365_v51 = vpop.permute.xlu0 %364 }
 0x49b   :  { %v369_v57 = vadd.f32 %v365_v51, %v349_v55  ;;  %v1254_v51 = vld [vmem:[%s1843_s7] ss:$0 sm:$0xff] }
 0x49c   :  { %v383_v53 = vpop.permute.xlu1 %382 }
 0x49d   :  { %v388_v58 = vadd.f32 %v383_v53, %v368_v54 }
 0x49e   :  { %v385_v56 = vpop.permute.xlu0 %384 }
 0x49f   :  { %v389_v60 = vadd.f32 %v385_v56, %v369_v57 }
 0x4a0   :  { %v403_v59 = vpop.permute.xlu1 %402 }
 0x4a1   :  { %v408_v61 = vadd.f32 %v403_v59, %v388_v58 }
 0x4a2   :  { %v405_v63 = vpop.permute.xlu0 %404 }
 0x4a3   :  { %v420_v1 = vmul.f32 %v1669_v48, %v408_v61  ;;  %v409_v2 = vadd.f32 %v405_v63, %v389_v60  ;;  %v1257_v63 = vld [vmem:[%s1844_s9] ss:$0 sm:$0xff] }
 0x4a5   :  { %v429_v3 = vadd.f32 %v1253_v62, %v420_v1  ;;  %v421_v4 = vmul.f32 %v1671_v49, %v409_v2 }
 0x4a7   :  { %v431_v5 = vmax.f32 %v429_v3, 0.0  ;;  %v430_v6 = vadd.f32 %v1253_v62, %v421_v4 }
 0x4a9   :  { %v432_v7 = vmax.f32 %v430_v6, 0.0  ;;  %v433_v8 = vsel %vm262_vm5, %v431_v5, 0.0 }
 0x4ab   :  { %v434_v10 = vsel %vm262_vm5, %v432_v7, 0.0 }
 0x4ac   :  { %v435_v11 = vadd.f32 %v434_v10, %v433_v8 }
 0x4ae   :  { %v436_v9 = vrot.slane %v435_v11, 4 }
 0x4b0   :  { %v437_v14 = vadd.f32 %v436_v9, %v435_v11 }
 0x4b2   :  { %v438_v17 = vrot.slane %v437_v14, 2 }
 0x4b4   :  { %v439_v18 = vadd.f32 %v438_v17, %v437_v14 }
 0x4b6   :  { %v440_v19 = vrot.slane %v439_v18, 1 }
 0x4b8   :  { %v441_v20 = vadd.f32 %v440_v19, %v439_v18 }
 0x4ba   :  { %v443_v22 = vmul.f32 0.0625, %v441_v20 }
 0x4bc   :  { %v444_v23 = vsub.f32 %v431_v5, %v443_v22  ;;  %v445_v24 = vsub.f32 %v432_v7, %v443_v22 }
 0x4be   :  { %v446_v25 = vmul.f32 %v444_v23, %v444_v23  ;;  %v447_v26 = vmul.f32 %v445_v24, %v445_v24 }
 0x4c0   :  { %v448_v27 = vsel %vm262_vm5, %v446_v25, 0.0  ;;  %v449_v28 = vsel %vm262_vm5, %v447_v26, 0.0 }
 0x4c1   :  { %v450_v29 = vadd.f32 %v449_v28, %v448_v27 }
 0x4c3   :  { %v451_v33 = vrot.slane %v450_v29, 4 }
 0x4c5   :  { %v452_v34 = vadd.f32 %v451_v33, %v450_v29 }
 0x4c7   :  { %v453_v35 = vrot.slane %v452_v34, 2 }
 0x4c9   :  { %v454_v36 = vadd.f32 %v453_v35, %v452_v34 }
 0x4cb   :  { %v455_v37 = vrot.slane %v454_v36, 1 }
 0x4cd   :  { %v456_v13 = vadd.f32 %v455_v37, %v454_v36 }
 0x4cf   :  { %v457_v38 = vmul.f32 0.0625, %v456_v13 }
 0x4d1   :  { %v458_v39 = vadd.f32 1e-05, %v457_v38 }
 0x4d3   :  { %1419 = vrsqrt.f32 %v458_v39 }
 0x4dd   :  { %v1420_v46 = vpop.eup %1419 }
 0x4de   :  { %v461_v47 = vmul.f32 %v1420_v46, %v460_v42 }
 0x4e0   :  { %v465_v50 = vrot.slane %v461_v47, %v464_v44 }
 0x4e2   :  { %v466_v52 = vmul.f32 %v465_v50, %v444_v23  ;;  %v467_v53 = vmul.f32 %v465_v50, %v445_v24 }
 0x4e4   :  { %v475_v54 = vadd.f32 %v1254_v51, %v466_v52  ;;  %v476_v55 = vadd.f32 %v1254_v51, %v467_v53 }
 0x4e6   :  { %v477_v56 = vpack.c.bf16 %v476_v55, %v475_v54 }
 0x4e8   :  { %1319 = vmatmul.mubr.msk.bf16.vlgmr.msra.gmra.mrb[4].mxu1 %vm262_vm5, %v477_v56 }
 0x4e9   :  { %1330 = vmatprep.mubr.msk.bf16.mxu1 %vm1448_vm1, %v1447_v0 }
 0x5bb   :  { %v1696_v57 = vpop.f32.mrb[4].mxu1 }
 0x5bc   :  { %539 = vrot.lane.b32.xlu1 %v1696_v57, %s1449_s0  ;;  %v1320_v58 = vpop.f32.mrb[5].mxu1  ;;  %v547_v62 = vsel %vm126_vm3, %v1696_v57, -inf }
 0x5bd   :  { %v1700_v59 = vpop.f32.mrb[6].mxu1 }
 0x5be   :  { %541 = vrot.lane.b32.xlu0 %v1700_v59, %s1449_s0  ;;  %v1321_v60 = vpop.f32.mrb[7].mxu1  ;;  %v550_v61 = vsel %vm126_vm3, %v1700_v59, -inf }
 0x5dd   :  { %551 = vmax.xlane.f32.xlu0 %v550_v61 }
 0x5e0   :  { %548 = vmax.xlane.f32.xlu1 %v547_v62 }
 0x62e   :  { %v540_v1 = vpop.permute.xlu1 %539 }
 0x62f   :  { %v545_v2 = vsub.f32 %v1257_v63, %v540_v1 }
 0x630   :  { %v542_v3 = vpop.permute.xlu0 %541 }
 0x631   :  { %v546_v4 = vsub.f32 %v1257_v63, %v542_v3  ;;  %v559_v5 = vsel %vm139_vm4, %v545_v2, -inf }
 0x632   :  { %560 = vmax.xlane.f32.xlu0 %v559_v5 }
 0x633   :  { %v562_v6 = vsel %vm139_vm4, %v546_v4, -inf }
 0x634   :  { %563 = vmax.xlane.f32.xlu1 %v562_v6 }
 0x66a   :  { %v552_v7 = vpop.xlane.xlu0 %551 }
 0x66b   :  { %v554_v8 = vsub.f32 %v1700_v59, %v552_v7 }
 0x66d   :  { %v557_v10 = vmul.f32 1.442695, %v554_v8  ;;  %v549_v11 = vpop.xlane.xlu1 %548 }
 0x66e   :  { %v553_v9 = vsub.f32 %v1696_v57, %v549_v11 }
 0x66f   :  { %1421 = vpow2.f32 %v557_v10 }
 0x670   :  { %v555_v14 = vmul.f32 1.442695, %v553_v9 }
 0x672   :  { %1423 = vpow2.f32 %v555_v14 }
 0x679   :  { %v1422_v17 = vpop.eup %1421 }
 0x67c   :  { %v1424_v18 = vpop.eup %1423 }
 0x67d   :  { %639 = vperm.xlu1 %1383, %v1424_v18   ;;  %v571_v19 = vpack.c.bf16 %v1422_v17, %v1424_v18 }
 0x67f   :  { %574 = vrot.lane.b32.xlu0 %v571_v19, %s1449_s0 }
 0x681   :  { %644 = vperm.xlu1 %1383, %v1422_v17  }
 0x683   :  { %650 = vperm.xlu0 %1384, %v1424_v18  }
 0x685   :  { %1385 = vset.pattern.permute.xlu1 %v1450_v12 }
 0x686   :  { %654 = vperm.xlu1 %1385, %v1422_v17  }
 0x687   :  { %1387 = vset.pattern.permute.xlu0 %v1453_v31 }
 0x688   :  { %664 = vperm.xlu0 %1387, %v1422_v17  }
 0x68a   :  { %1386 = vset.pattern.permute.xlu1 %v1453_v31 }
 0x68b   :  { %660 = vperm.xlu1 %1386, %v1424_v18  }
 0x68f   :  { %1388 = vset.pattern.permute.xlu1 %v1454_v32 }
 0x690   :  { %670 = vperm.xlu1 %1388, %v1424_v18  }
 0x694   :  { %674 = vperm.xlu1 %1388, %v1422_v17  }
 0x698   :  { %1389 = vset.pattern.permute.xlu1 %v1452_v30 }
 0x6bf   :  { %v561_v20 = vpop.xlane.xlu0 %560 }
 0x6c0   :  { %v565_v22 = vsub.f32 %v545_v2, %v561_v20 }
 0x6c1   :  { %v564_v23 = vpop.xlane.xlu1 %563 }
 0x6c2   :  { %v567_v24 = vmul.f32 1.442695, %v565_v22  ;;  %v566_v25 = vsub.f32 %v546_v4, %v564_v23 }
 0x6c4   :  { %1425 = vpow2.f32 %v567_v24  ;;  %v569_v12 = vmul.f32 1.442695, %v566_v25 }
 0x6c6   :  { %1427 = vpow2.f32 %v569_v12 }
 0x6ce   :  { %v1426_v26 = vpop.eup %1425 }
 0x6cf   :  { %765 = vperm.xlu1 %1389, %v1426_v26  }
 0x6d0   :  { %v1428_v27 = vpop.eup %1427 }
 0x6d1   :  { %v572_v28 = vpack.c.bf16 %v1428_v27, %v1426_v26 }
 0x6d3   :  { %769 = vperm.xlu1 %1389, %v1428_v27   ;;  %v580_v31 = vsel %vm139_vm4, %v572_v28, 0 }
 0x6d4   :  { %1323 = vmatpush3.bf16.xpose.msra.mxu0 %v580_v31  ;;  %v1406_v31 = vld [vmem:[%s1845_s13] sm:$0xff]  }
 0x6d5   :  { %1334 = vmatprep.subr.bf16.mxu0 %v1447_v0 }
 0x6d7   :  { %1390 = vset.pattern.permute.xlu1 %v1455_v43 }
 0x6d8   :  { %785 = vperm.xlu1 %1390, %v1426_v26  }
 0x6dc   :  { %789 = vperm.xlu1 %1390, %v1428_v27  }
 0x6e0   :  { %1391 = vset.pattern.permute.xlu1 %v1457_v21 }
 0x6e1   :  { %805 = vperm.xlu1 %1391, %v1426_v26  }
 0x6e5   :  { %809 = vperm.xlu1 %1391, %v1428_v27  }
 0x6e9   :  { %1392 = vset.pattern.permute.xlu1 %v1456_v45 }
 0x6ea   :  { %754 = vperm.xlu1 %1392, %v1426_v26  }
 0x6ee   :  { %759 = vperm.xlu1 %1392, %v1428_v27  }
 0x6f1   :  { %v575_v32 = vpop.permute.xlu0 %574 }
 0x6f2   :  { %1325 = vmatmul.mubr.msk.bf16.vlgmr.msra.gmra.mrb[8].mxu0 %vm139_vm4, %v575_v32 }
 0x6f3   :  { %1336 = vmatprep.mubr.msk.bf16.mxu0 %vm1448_vm1, %v1447_v0  ;;  %1335 = vmatpush3.bf16.msra.mxu0 %v1406_v31  ;;  %v1264_v31 = vld [vmem:[%s1848_s12] ss:$0 sm:$0xff] }
 0x6f4   :  { %1346 = vmatprep.subr.bf16.mxu0 %v1447_v0 }
 0x6fc   :  { %v640_v29 = vpop.permute.xlu1 %639 }
 0x6fd   :  { %v647_v47 = vmul.f32 %v640_v29, %v1696_v57 }
 0x700   :  { %v645_v33 = vpop.permute.xlu1 %644 }
 0x701   :  { %v648_v39 = vmul.f32 %v645_v33, %v1700_v59 }
 0x702   :  { %v651_v35 = vpop.permute.xlu0 %650 }
 0x703   :  { %v657_v40 = vmul.f32 %v651_v35, %v1696_v57 }
 0x705   :  { %v655_v34 = vpop.permute.xlu1 %654  ;;  %v679_v53 = vsel %vm262_vm5, %v647_v47, %v657_v40 }
 0x706   :  { %v658_v37 = vmul.f32 %v655_v34, %v1700_v59 }
 0x707   :  { %v665_v13 = vpop.permute.xlu0 %664 }
 0x708   :  { %v668_v42 = vmul.f32 %v665_v13, %v1700_v59  ;;  %v680_v50 = vsel %vm262_vm5, %v648_v39, %v658_v37 }
 0x70a   :  { %v661_v36 = vpop.permute.xlu1 %660  ;;  %v682_v55 = vsel %vm265_vm6, %v680_v50, %v668_v42 }
 0x70b   :  { %v667_v46 = vmul.f32 %v661_v36, %v1696_v57 }
 0x70d   :  { %v681_v56 = vsel %vm265_vm6, %v679_v53, %v667_v46 }
 0x70f   :  { %v671_v38 = vpop.permute.xlu1 %670 }
 0x710   :  { %v677_v51 = vmul.f32 %v671_v38, %v1696_v57 }
 0x712   :  { %v683_v58 = vsel %vm268_vm7, %v681_v56, %v677_v51 }
 0x713   :  { %v675_v52 = vpop.permute.xlu1 %674 }
 0x714   :  { %v678_v54 = vmul.f32 %v675_v52, %v1700_v59  ;;  %v1263_v52 = vld [vmem:[%s1846_s10] ss:$0 sm:$0xff] }
 0x716   :  { %v684_v60 = vsel %vm268_vm7, %v682_v55, %v678_v54 }
 0x717   :  { %v685_v61 = vpack.c.bf16 %v684_v60, %v683_v58 }
 0x719   :  { %1329 = vmatpush3.bf16.msra.mxu1 %v685_v61 }
 0x71a   :  { %1340 = vmatprep.subr.bf16.mxu1 %v1447_v0 }
 0x74e   :  { %v766_v10 = vpop.permute.xlu1 %765 }
 0x752   :  { %v770_v11 = vpop.permute.xlu1 %769 }
 0x757   :  { %v786_v9 = vpop.permute.xlu1 %785 }
 0x75b   :  { %v790_v14 = vpop.permute.xlu1 %789 }
 0x760   :  { %v806_v22 = vpop.permute.xlu1 %805 }
 0x764   :  { %v810_v26 = vpop.permute.xlu1 %809 }
 0x769   :  { %v755_v32 = vpop.permute.xlu1 %754 }
 0x76d   :  { %v760_v29 = vpop.permute.xlu1 %759 }
 0x7c5   :  { %v616_v62 = vpop.f32.mrb[8].mxu0 }
 0x7c6   :  { %1429 = vrcp.f32 %v616_v62  ;;  %v1326_v57 = vpop.f32.mrb[9].mxu0 }
 0x7c7   :  { %v619_v63 = vpop.f32.mrb[10].mxu0 }
 0x7c8   :  { %1431 = vrcp.f32 %v619_v63  ;;  %v1327_v1 = vpop.f32.mrb[11].mxu0 }
 0x7d0   :  { %v1430_v2 = vpop.eup %1429 }
 0x7d1   :  { %v1276_v59 = vpack.c.bf16 %v1430_v2, %v1430_v2 }
 0x7d2   :  { %v1432_v3 = vpop.eup %1431 }
 0x7d3   :  { %v1277_v4 = vpack.c.bf16 %v1432_v3, %v1432_v3  ;;  %v635_v5 = vmul.bf16 %v1276_v59, %v1632_v15 }
 0x7d5   :  { %v636_v6 = vmul.bf16 %v1277_v4, %v1637_v16 }
 0x7d7   :  { %v1261_v7 = vcombine.low %v635_v5, %v636_v6 }
 0x7d9   :  { %692 = vxpose.xlu0.c.b16.start.end [1/1] (short) (narrow) %v1261_v7, 16 }
 0x83f   :  { %v700_v8 = vpop.trf.xlu0 }
 0x840   :  { %1331 = vmatmul.mubr.msk.bf16.vlgmr.msra.gmra.mrb[8].mxu1 %vm262_vm5, %v700_v8 }
 0x841   :  { %1342 = vmatprep.mubr.msk.bf16.mxu1 %vm1448_vm1, %v1447_v0 }
 0x913   :  { %v745_v17 = vpop.f32.mrb[8].mxu1 }
 0x914   :  { %v1332_v18 = vpop.f32.mrb[9].mxu1  ;;  %v792_v19 = vmul.f32 %v786_v9, %v745_v17  ;;  %v772_v20 = vmul.f32 %v766_v10, %v745_v17  ;;  %v812_v28 = vmul.f32 %v806_v22, %v745_v17  ;;  %v762_v35 = vmul.f32 %v755_v32, %v745_v17 }
 0x915   :  { %v748_v23 = vpop.f32.mrb[10].mxu1 }
 0x916   :  { %796 = vrot.lane.b32.xlu1 %v792_v19, %s1459_s2  ;;  %776 = vrot.lane.b32.xlu0 %v772_v20, %s1458_s21  ;;  %v1333_v24 = vpop.f32.mrb[11].mxu1  ;;  %v793_v25 = vmul.f32 %v790_v14, %v748_v23  ;;  %v773_v12 = vmul.f32 %v770_v11, %v748_v23  ;;  %v813_v27 = vmul.f32 %v810_v26, %v748_v23 }
 0x917   :  { %v763_v37 = vmul.f32 %v760_v29, %v748_v23 }
 0x91a   :  { %798 = vrot.lane.b32.xlu0 %v793_v25, %s1459_s2  ;;  %778 = vrot.lane.b32.xlu1 %v773_v12, %s1458_s21  ;;  %v863_v12 = vld [vmem:[%s1847_s11] sm:$0x1] }
 0x91e   :  { %818 = vrot.lane.b32.xlu0 %v813_v27, %s1460_s22  ;;  %816 = vrot.lane.b32.xlu1 %v812_v28, %s1460_s22 }
 0x988   :  { %v797_v33 = vpop.permute.xlu1 %796  ;;  %v777_v34 = vpop.permute.xlu0 %776 }
 0x989   :  { %v782_v36 = vadd.f32 %v777_v34, %v762_v35 }
 0x98b   :  { %v802_v42 = vadd.f32 %v797_v33, %v782_v36 }
 0x98c   :  { %v799_v13 = vpop.permute.xlu0 %798  ;;  %v779_v38 = vpop.permute.xlu1 %778 }
 0x98d   :  { %v783_v39 = vadd.f32 %v779_v38, %v763_v37 }
 0x98f   :  { %v803_v40 = vadd.f32 %v799_v13, %v783_v39  ;;  %v1462_v39 = vmov 33  }
 0x990   :  { %v819_v46 = vpop.permute.xlu0 %818  ;;  %v817_v47 = vpop.permute.xlu1 %816  ;;  %1394 = vset.pattern.permute.xlu0 %v1462_v39 }
 0x991   :  { %v823_v50 = vadd.f32 %v819_v46, %v803_v40  ;;  %v822_v51 = vadd.f32 %v817_v47, %v802_v42  ;;  %v1267_v40 = vld [vmem:[%s1849_s14] ss:$0 sm:$0xff]  ;;  %s1465_s14 = smov 120  }
 0x993   :  { %v825_v53 = vmul.f32 %v823_v50, %v1671_v49  ;;  %v824_v54 = vmul.f32 %v822_v51, %v1669_v48 }
 0x995   :  { %v834_v55 = vadd.f32 %v1263_v52, %v825_v53  ;;  %v833_v56 = vadd.f32 %v1263_v52, %v824_v54 }
 0x997   :  { %v836_v58 = vmax.f32 %v834_v55, 0.0  ;;  %v835_v60 = vmax.f32 %v833_v56, 0.0 }
 0x999   :  { %v838_v61 = vsel %vm262_vm5, %v836_v58, 0.0  ;;  %v837_v62 = vsel %vm262_vm5, %v835_v60, 0.0 }
 0x99a   :  { %v839_v57 = vadd.f32 %v838_v61, %v837_v62 }
 0x99c   :  { %v840_v63 = vrot.slane %v839_v57, 4 }
 0x99e   :  { %v841_v1 = vadd.f32 %v840_v63, %v839_v57  ;;  %v1463_v63 = vmov 34  }
 0x9a0   :  { %v842_v2 = vrot.slane %v841_v1, 2 }
 0x9a2   :  { %v843_v59 = vadd.f32 %v842_v2, %v841_v1  ;;  %v1464_v1 = vmov 35  }
 0x9a4   :  { %v844_v3 = vrot.slane %v843_v59, 1 }
 0x9a6   :  { %v845_v4 = vadd.f32 %v844_v3, %v843_v59 }
 0x9a8   :  { %v846_v5 = vmul.f32 0.0625, %v845_v4 }
 0x9aa   :  { %v847_v6 = vsub.f32 %v835_v60, %v846_v5  ;;  %v848_v7 = vsub.f32 %v836_v58, %v846_v5 }
 0x9ac   :  { %v849_v8 = vmul.f32 %v847_v6, %v847_v6  ;;  %v850_v10 = vmul.f32 %v848_v7, %v848_v7 }
 0x9ae   :  { %v851_v11 = vsel %vm262_vm5, %v849_v8, 0.0  ;;  %v852_v9 = vsel %vm262_vm5, %v850_v10, 0.0 }
 0x9af   :  { %v853_v14 = vadd.f32 %v852_v9, %v851_v11 }
 0x9b1   :  { %v854_v17 = vrot.slane %v853_v14, 4 }
 0x9b3   :  { %v855_v18 = vadd.f32 %v854_v17, %v853_v14 }
 0x9b5   :  { %v856_v19 = vrot.slane %v855_v18, 2 }
 0x9b7   :  { %v857_v20 = vadd.f32 %v856_v19, %v855_v18 }
 0x9b9   :  { %v858_v22 = vrot.slane %v857_v20, 1 }
 0x9bb   :  { %v859_v23 = vadd.f32 %v858_v22, %v857_v20 }
 0x9bd   :  { %v860_v24 = vmul.f32 0.0625, %v859_v23 }
 0x9bf   :  { %v861_v25 = vadd.f32 1e-05, %v860_v24 }
 0x9c1   :  { %1433 = vrsqrt.f32 %v861_v25 }
 0x9cb   :  { %v1434_v26 = vpop.eup %1433 }
 0x9cc   :  { %v864_v27 = vmul.f32 %v1434_v26, %v863_v12 }
 0x9ce   :  { %v868_v28 = vrot.slane %v864_v27, %v464_v44 }
 0x9d0   :  { %v869_v32 = vmul.f32 %v868_v28, %v847_v6  ;;  %v870_v29 = vmul.f32 %v868_v28, %v848_v7 }
 0x9d2   :  { %v878_v33 = vadd.f32 %v1264_v31, %v869_v32  ;;  %v879_v34 = vadd.f32 %v1264_v31, %v870_v29 }
 0x9d4   :  { %v880_v35 = vpack.c.bf16 %v879_v34, %v878_v33 }
 0x9d6   :  { %1337 = vmatmul.mubr.msk.bf16.vlgmr.msra.gmra.mrb[12].mxu0 %vm262_vm5, %v880_v35 }
 0x9d7   :  { %1348 = vmatprep.mubr.msk.bf16.mxu0 %vm1448_vm1, %v1447_v0  ;;  %v1461_v0 = vmov 32  }
 0x9d8   :  { %1393 = vset.pattern.permute.xlu1 %v1461_v0 }
 0xaa9   :  { %v1779_v36 = vpop.f32.mrb[12].mxu0 }
 0xaaa   :  { %942 = vrot.lane.b32.xlu1 %v1779_v36, %s1459_s2  ;;  %v1338_v41 = vpop.f32.mrb[13].mxu0  ;;  %v951_v38 = vsel %vm950_vm8, %v1779_v36, -inf }
 0xaab   :  { %v1783_v44 = vpop.f32.mrb[14].mxu0 }
 0xaac   :  { %944 = vrot.lane.b32.xlu0 %v1783_v44, %s1459_s2  ;;  %v1339_v37 = vpop.f32.mrb[15].mxu0  ;;  %v954_v13 = vsel %vm950_vm8, %v1783_v44, -inf }
 0xacb   :  { %955 = vmax.xlane.f32.xlu0 %v954_v13 }
 0xace   :  { %952 = vmax.xlane.f32.xlu1 %v951_v38 }
 0xb1c   :  { %v943_v42 = vpop.permute.xlu1 %942 }
 0xb1d   :  { %v948_v46 = vsub.f32 %v1267_v40, %v943_v42 }
 0xb1e   :  { %v945_v47 = vpop.permute.xlu0 %944 }
 0xb1f   :  { %v949_v50 = vsub.f32 %v1267_v40, %v945_v47  ;;  %v963_v51 = vsel %vm139_vm4, %v948_v46, -inf }
 0xb20   :  { %964 = vmax.xlane.f32.xlu0 %v963_v51 }
 0xb21   :  { %v966_v52 = vsel %vm139_vm4, %v949_v50, -inf }
 0xb22   :  { %967 = vmax.xlane.f32.xlu1 %v966_v52 }
 0xb58   :  { %v956_v53 = vpop.xlane.xlu0 %955 }
 0xb59   :  { %v958_v54 = vsub.f32 %v1783_v44, %v956_v53 }
 0xb5b   :  { %v961_v55 = vmul.f32 1.442695, %v958_v54  ;;  %v953_v56 = vpop.xlane.xlu1 %952 }
 0xb5c   :  { %v957_v58 = vsub.f32 %v1779_v36, %v953_v56 }
 0xb5d   :  { %1435 = vpow2.f32 %v961_v55 }
 0xb5e   :  { %v959_v60 = vmul.f32 1.442695, %v957_v58 }
 0xb60   :  { %1437 = vpow2.f32 %v959_v60 }
 0xb67   :  { %v1436_v61 = vpop.eup %1435 }
 0xb6a   :  { %v1438_v62 = vpop.eup %1437 }
 0xb6b   :  { %1043 = vperm.xlu1 %1393, %v1438_v62   ;;  %v975_v57 = vpack.c.bf16 %v1436_v61, %v1438_v62 }
 0xb6d   :  { %978 = vrot.lane.b32.xlu0 %v975_v57, %s1459_s2 }
 0xb6f   :  { %1048 = vperm.xlu1 %1393, %v1436_v61  }
 0xb71   :  { %1054 = vperm.xlu0 %1394, %v1438_v62  }
 0xb73   :  { %1395 = vset.pattern.permute.xlu1 %v1462_v39 }
 0xb74   :  { %1058 = vperm.xlu1 %1395, %v1436_v61  }
 0xb75   :  { %1397 = vset.pattern.permute.xlu0 %v1463_v63 }
 0xb76   :  { %1068 = vperm.xlu0 %1397, %v1436_v61  }
 0xb78   :  { %1396 = vset.pattern.permute.xlu1 %v1463_v63 }
 0xb79   :  { %1064 = vperm.xlu1 %1396, %v1438_v62  }
 0xb7d   :  { %1398 = vset.pattern.permute.xlu1 %v1464_v1 }
 0xb7e   :  { %1074 = vperm.xlu1 %1398, %v1438_v62  }
 0xb82   :  { %1078 = vperm.xlu1 %1398, %v1436_v61  }
 0xb86   :  { %1399 = vset.pattern.permute.xlu1 %v1452_v30 }
 0xbad   :  { %v965_v2 = vpop.xlane.xlu0 %964 }
 0xbae   :  { %v969_v59 = vsub.f32 %v948_v46, %v965_v2 }
 0xbaf   :  { %v968_v3 = vpop.xlane.xlu1 %967 }
 0xbb0   :  { %v971_v4 = vmul.f32 1.442695, %v969_v59  ;;  %v970_v5 = vsub.f32 %v949_v50, %v968_v3 }
 0xbb2   :  { %1439 = vpow2.f32 %v971_v4  ;;  %v973_v6 = vmul.f32 1.442695, %v970_v5 }
 0xbb4   :  { %1441 = vpow2.f32 %v973_v6 }
 0xbbc   :  { %v1440_v7 = vpop.eup %1439 }
 0xbbd   :  { %1170 = vperm.xlu1 %1399, %v1440_v7  }
 0xbbe   :  { %v1442_v8 = vpop.eup %1441 }
 0xbbf   :  { %v976_v10 = vpack.c.bf16 %v1442_v8, %v1440_v7 }
 0xbc1   :  { %1174 = vperm.xlu1 %1399, %v1442_v8   ;;  %v984_v11 = vsel %vm139_vm4, %v976_v10, 0 }
 0xbc2   :  { %1341 = vmatpush3.bf16.xpose.msra.mxu1 %v984_v11 }
 0xbc5   :  { %1400 = vset.pattern.permute.xlu1 %v1455_v43 }
 0xbc6   :  { %1190 = vperm.xlu1 %1400, %v1440_v7  }
 0xbca   :  { %1194 = vperm.xlu1 %1400, %v1442_v8  }
 0xbce   :  { %1401 = vset.pattern.permute.xlu1 %v1457_v21 }
 0xbcf   :  { %1210 = vperm.xlu1 %1401, %v1440_v7  }
 0xbd3   :  { %1214 = vperm.xlu1 %1401, %v1442_v8  }
 0xbd7   :  { %1402 = vset.pattern.permute.xlu1 %v1456_v45 }
 0xbd8   :  { %1159 = vperm.xlu1 %1402, %v1440_v7  }
 0xbdf   :  { %v979_v30 = vpop.permute.xlu0 %978 }
 0xbe0   :  { %1343 = vmatmul.mubr.msk.bf16.vlgmr.msra.gmra.mrb[12].mxu1 %vm139_vm4, %v979_v30 }
 0xbea   :  { %v1044_v9 = vpop.permute.xlu1 %1043 }
 0xbeb   :  { %v1051_v26 = vmul.f32 %v1044_v9, %v1779_v36 }
 0xbee   :  { %v1049_v14 = vpop.permute.xlu1 %1048 }
 0xbef   :  { %v1052_v23 = vmul.f32 %v1049_v14, %v1783_v44 }
 0xbf0   :  { %v1055_v18 = vpop.permute.xlu0 %1054 }
 0xbf1   :  { %v1061_v24 = vmul.f32 %v1055_v18, %v1779_v36 }
 0xbf3   :  { %v1059_v17 = vpop.permute.xlu1 %1058  ;;  %v1083_v32 = vsel %vm60_vm2, %v1051_v26, %v1061_v24 }
 0xbf4   :  { %v1062_v20 = vmul.f32 %v1059_v17, %v1783_v44 }
 0xbf5   :  { %v1069_v43 = vpop.permute.xlu0 %1068 }
 0xbf6   :  { %v1072_v25 = vmul.f32 %v1069_v43, %v1783_v44  ;;  %v1084_v27 = vsel %vm60_vm2, %v1052_v23, %v1062_v20  ;;  %v1273_v20 = vld [vmem:[%s1850_s15] ss:$0 sm:$0xff] }
 0xbf8   :  { %v1065_v19 = vpop.permute.xlu1 %1064  ;;  %v1086_v33 = vsel %vm262_vm5, %v1084_v27, %v1072_v25 }
 0xbf9   :  { %v1071_v12 = vmul.f32 %v1065_v19, %v1779_v36 }
 0xbfb   :  { %v1085_v34 = vsel %vm262_vm5, %v1083_v32, %v1071_v12 }
 0xbfd   :  { %v1075_v22 = vpop.permute.xlu1 %1074 }
 0xbfe   :  { %v1081_v28 = vmul.f32 %v1075_v22, %v1779_v36 }
 0xc00   :  { %v1088_v35 = vsel %vm1087_vm9, %v1085_v34, %v1081_v28 }
 0xc01   :  { %v1079_v31 = vpop.permute.xlu1 %1078 }
 0xc02   :  { %v1082_v29 = vmul.f32 %v1079_v31, %v1783_v44 }
 0xc04   :  { %v1089_v41 = vsel %vm1087_vm9, %v1086_v33, %v1082_v29 }
 0xc05   :  { %v1090_v37 = vpack.c.bf16 %v1089_v41, %v1088_v35 }
 0xc07   :  { %1347 = vmatpush3.bf16.msra.mxu0 %v1090_v37 }
 0xc3c   :  { %v1171_v52 = vpop.permute.xlu1 %1170 }
 0xc40   :  { %v1175_v53 = vpop.permute.xlu1 %1174 }
 0xc45   :  { %v1191_v54 = vpop.permute.xlu1 %1190 }
 0xc49   :  { %v1195_v55 = vpop.permute.xlu1 %1194 }
 0xc4e   :  { %v1211_v56 = vpop.permute.xlu1 %1210 }
 0xcb3   :  { %v1020_v13 = vpop.f32.mrb[12].mxu1 }
 0xcb4   :  { %1443 = vrcp.f32 %v1020_v13  ;;  %v1344_v38 = vpop.f32.mrb[13].mxu1 }
 0xcb5   :  { %v1023_v0 = vpop.f32.mrb[14].mxu1 }
 0xcb6   :  { %1445 = vrcp.f32 %v1023_v0  ;;  %v1345_v36 = vpop.f32.mrb[15].mxu1 }
 0xcbe   :  { %v1444_v39 = vpop.eup %1443 }
 0xcbf   :  { %v1278_v40 = vpack.c.bf16 %v1444_v39, %v1444_v39 }
 0xcc0   :  { %v1446_v42 = vpop.eup %1445 }
 0xcc1   :  { %v1279_v46 = vpack.c.bf16 %v1446_v42, %v1446_v42  ;;  %v1039_v44 = vmul.bf16 %v1278_v40, %v1632_v15 }
 0xcc3   :  { %v1040_v47 = vmul.bf16 %v1279_v46, %v1637_v16 }
 0xcc5   :  { %v1271_v50 = vcombine.low %v1039_v44, %v1040_v47 }
 0xcc7   :  { %1097 = vxpose.xlu0.c.b16.start.end [1/1] (short) (narrow) %v1271_v50, 16 }
 0xcd0   :  { %1403 = vset.pattern.permute.xlu0 %v1456_v45 }
 0xcd1   :  { %1164 = vperm.xlu0 %1403, %v1442_v8  }
 0xcd5   :  { %1404 = vset.pattern.permute.xlu0 %v1457_v21  ;;  %v1215_v21 = vpop.permute.xlu1 %1214 }
 0xcd9   :  { %v1160_v2 = vpop.permute.xlu1 %1159 }
 0xd2d   :  { %v1105_v51 = vpop.trf.xlu0 }
 0xd2e   :  { %1349 = vmatmul.mubr.msk.bf16.vlgmr.msra.gmra.mrb[16].mxu0 %vm262_vm5, %v1105_v51 }
 0xd50   :  { %v1165_v3 = vpop.permute.xlu0 %1164 }
 0xe01   :  { %v1150_v58 = vpop.f32.mrb[16].mxu0 }
 0xe02   :  { %v1177_v60 = vmul.f32 %v1171_v52, %v1150_v58  ;;  %v1350_v15 = vpop.f32.mrb[17].mxu0  ;;  %v1197_v45 = vmul.f32 %v1191_v54, %v1150_v58  ;;  %v1217_v1 = vmul.f32 %v1211_v56, %v1150_v58  ;;  %v1167_v6 = vmul.f32 %v1160_v2, %v1150_v58 }
 0xe03   :  { %v1153_v61 = vpop.f32.mrb[18].mxu0 }
 0xe04   :  { %1181 = vrot.lane.b32.xlu1 %v1177_v60, %s1465_s14  ;;  %v1351_v16 = vpop.f32.mrb[19].mxu0  ;;  %v1198_v62 = vmul.f32 %v1195_v55, %v1153_v61  ;;  %v1218_v57 = vmul.f32 %v1215_v21, %v1153_v61  ;;  %v1178_v63 = vmul.f32 %v1175_v53, %v1153_v61  ;;  %v1168_v7 = vmul.f32 %v1165_v3, %v1153_v61 }
 0xe06   :  { %1203 = vrot.lane.b32.xlu0 %v1198_v62, %s1458_s21 }
 0xe08   :  { %1201 = vrot.lane.b32.xlu1 %v1197_v45, %s1458_s21 }
 0xe0a   :  { %1223 = vrot.lane.b32.xlu0 %v1218_v57, %s1466_s17 }
 0xe0c   :  { %1183 = vrot.lane.b32.xlu1 %v1178_v63, %s1465_s14 }
 0xe10   :  { %1221 = vrot.lane.b32.xlu1 %v1217_v1, %s1466_s17 }
 0xe76   :  { %v1182_v59 = vpop.permute.xlu1 %1181 }
 0xe77   :  { %v1187_v10 = vadd.f32 %v1182_v59, %v1167_v6 }
 0xe78   :  { %v1204_v5 = vpop.permute.xlu0 %1203 }
 0xe7a   :  { %v1202_v4 = vpop.permute.xlu1 %1201 }
 0xe7b   :  { %v1207_v30 = vadd.f32 %v1202_v4, %v1187_v10 }
 0xe7c   :  { %v1224_v14 = vpop.permute.xlu0 %1223 }
 0xe7e   :  { %v1184_v8 = vpop.permute.xlu1 %1183 }
 0xe7f   :  { %v1188_v11 = vadd.f32 %v1184_v8, %v1168_v7 }
 0xe81   :  { %v1208_v9 = vadd.f32 %v1204_v5, %v1188_v11 }
 0xe82   :  { %v1222_v17 = vpop.permute.xlu1 %1221 }
 0xe83   :  { %v1228_v18 = vadd.f32 %v1224_v14, %v1208_v9  ;;  %v1227_v19 = vadd.f32 %v1222_v17, %v1207_v30 }
 0xe85   :  { %v1230_v43 = vmul.f32 %v1228_v18, %v1671_v49  ;;  %v1229_v22 = vmul.f32 %v1227_v19, %v1669_v48 }
 0xe87   :  { %v1238_v23 = vadd.f32 %v1273_v20, %v1229_v22  ;;  %v1239_v24 = vadd.f32 %v1273_v20, %v1230_v43 }
 0xe89   :  { %1240 = vst.msk [vmem:[%s1851_s16] sm:$0xff] %vm60_vm2, %v1238_v23  ;;  %1241 = vst.msk [vmem:[%s1851_s16 + $0x8] sm:$0xff] %vm60_vm2, %v1239_v24 }

</bundles_post_ra>
